<compile_context>
chip_gen: v7x
topology: tpu7x:2x2x1
jax: 0.10.0
libtpu: 0.0.40
codegen_flags: <defaults>
</compile_context>

<pallas_src>
import jax
import jax.numpy as jnp
from jax import lax
from jax.experimental import pallas as pl
from jax.experimental.pallas import tpu as pltpu

D_IN, D_H1, D_H2, D_OUT = 4000, 512, 64, 2   # fc1: 4000->512, fc2: 512->64, fc3: 64->2
D_IN_PAD = 4096                              # K padded to a multiple of 128
TK = 1024                                    # K tile -> grid of 4 pipelined steps


def _softplus(z):
    # Numerically stable softplus == nn.Softplus(beta=1) up to fp32 rounding.
    return jnp.maximum(z, 0.0) + jnp.log1p(jnp.exp(-jnp.abs(z)))


def linear_layers_kernel(x_ref, w1_ref, b1_ref, w2_ref, b2_ref, dnu_ref,
                         w3_ref, b3_ref, o_ref, acc_ref):
    # x: (B, TK) bf16; w1: (TK, 512) bf16; w2/w3/biases f32 (tiny);
    # dnu: (B, 1); o: (B, 2); acc: (B, 512) f32 scratch accumulator.
    k = pl.program_id(0)

    @pl.when(k == 0)
    def _():
        acc_ref[...] = jnp.zeros_like(acc_ref)

    # fc1 partial contraction over this K tile (bf16 operands, f32 accumulate).
    acc_ref[...] += jnp.dot(x_ref[...], w1_ref[...],
                            preferred_element_type=jnp.float32)

    @pl.when(k == pl.num_programs(0) - 1)
    def _():
        h1 = _softplus(acc_ref[...] + b1_ref[...])                     # (B, 512)
        h2 = jnp.dot(h1, w2_ref[...],
                     preferred_element_type=jnp.float32) + b2_ref[...]
        h2 = _softplus(h2) + dnu_ref[...]                              # (B, 64) + (B, 1)
        out = jnp.dot(h2, w3_ref[...],
                      preferred_element_type=jnp.float32) + b3_ref[...]
        o_ref[...] = out.astype(o_ref.dtype)                           # (B, 2)


def _sample_weights_and_kl(params, key):
    # TODO(synk): BBBLinearFactorial definition is not in model.py; assumed to be a
    # fully-factorized Gaussian posterior with reparameterized weight/bias sampling
    # and a closed-form KL against a unit-Gaussian prior.
    sampled = []
    kl = jnp.zeros((), jnp.float32)
    keys = jax.random.split(key, 2 * len(params))
    for i, (w_mu, w_logvar, b_mu, b_logvar) in enumerate(params):
        w = w_mu + jnp.exp(0.5 * w_logvar) * jax.random.normal(
            keys[2 * i], w_mu.shape, w_mu.dtype)
        b = b_mu + jnp.exp(0.5 * b_logvar) * jax.random.normal(
            keys[2 * i + 1], b_mu.shape, b_mu.dtype)
        kl = kl + 0.5 * jnp.sum(jnp.exp(w_logvar) + w_mu ** 2 - 1.0 - w_logvar)
        kl = kl + 0.5 * jnp.sum(jnp.exp(b_logvar) + b_mu ** 2 - 1.0 - b_logvar)
        sampled.append((w, b))
    return sampled, kl


def linear_layers_forward(x, input_dnu, params, key):
    """Forward of Linear_Layers.  Returns (out, kl) like the PyTorch module."""
    sampled, kl = _sample_weights_and_kl(params, key)
    (w1, b1), (w2, b2), (w3, b3) = sampled
    B = x.shape[0]

    # Pad the contraction dim to 4096 (zeros contribute nothing) and cast the
    # dominant fc1 streams to bf16; everything downstream stays f32 (tiny).
    x_p = jnp.pad(x, ((0, 0), (0, D_IN_PAD - D_IN))).astype(jnp.bfloat16)
    w1_p = jnp.pad(w1, ((0, D_IN_PAD - D_IN), (0, 0))).astype(jnp.bfloat16)

    flops = 2 * B * (D_IN_PAD * D_H1 + D_H1 * D_H2 + D_H2 * D_OUT)
    bytes_accessed = (x_p.size * 2 + w1_p.size * 2 + w2.size * 4 + w3.size * 4
                      + (D_H1 + D_H2 + D_OUT) * 4 + B * 4 + B * D_OUT * 4)
    cost = pl.CostEstimate(flops=flops,
                           transcendentals=2 * B * (D_H1 + D_H2),
                           bytes_accessed=bytes_accessed)

    out = pl.pallas_call(
        linear_layers_kernel,
        out_shape=jax.ShapeDtypeStruct((B, D_OUT), x.dtype),
        grid_spec=pltpu.PrefetchScalarGridSpec(
            num_scalar_prefetch=0,
            grid=(D_IN_PAD // TK,),
            in_specs=[
                pl.BlockSpec((B, TK), lambda k: (0, k)),          # x (bf16), K-tiled
                pl.BlockSpec((TK, D_H1), lambda k: (k, 0)),       # w1 (bf16), K-tiled
                pl.BlockSpec((1, D_H1), lambda k: (0, 0)),        # b1
                pl.BlockSpec((D_H1, D_H2), lambda k: (0, 0)),     # w2
                pl.BlockSpec((1, D_H2), lambda k: (0, 0)),        # b2
                pl.BlockSpec((B, 1), lambda k: (0, 0)),           # dnu
                pl.BlockSpec((D_H2, D_OUT), lambda k: (0, 0)),    # w3
                pl.BlockSpec((1, D_OUT), lambda k: (0, 0)),       # b3
            ],
            out_specs=pl.BlockSpec((B, D_OUT), lambda k: (0, 0)),
            scratch_shapes=[pltpu.VMEM((B, D_H1), jnp.float32)],  # fc1 accumulator
        ),
        compiler_params=pltpu.CompilerParams(
            dimension_semantics=("arbitrary",),                   # K is a reduction axis
            vmem_limit_bytes=16 * 1024 * 1024,
        ),
        cost_estimate=cost,
    )(x_p, w1_p, b1.reshape(1, D_H1), w2, b2.reshape(1, D_H2),
      input_dnu.reshape(B, 1).astype(jnp.float32), w3, b3.reshape(1, D_OUT))
    return out, kl


def ref_forward(x, input_dnu, params, key):
    """Pure-JAX f32 reference (same sampled weights) for correctness checking."""
    sampled, kl = _sample_weights_and_kl(params, key)
    (w1, b1), (w2, b2), (w3, b3) = sampled
    hp = lax.Precision.HIGHEST
    h1 = _softplus(jnp.dot(x, w1, precision=hp) + b1)
    h2 = _softplus(jnp.dot(h1, w2, precision=hp) + b2) + input_dnu[:, None]
    out = jnp.dot(h2, w3, precision=hp) + b3
    return out, kl


if __name__ == "__main__":
    B = 8  # small batch; feature dims (4000/512/64/2) are fixed by the module

    key = jax.random.PRNGKey(0)
    k_x, k_dnu, k_p, k_eps = jax.random.split(key, 4)

    x = jax.random.normal(k_x, (B, D_IN), jnp.float32)
    input_dnu = jax.random.normal(k_dnu, (B,), jnp.float32)

    # Variational parameters (mean, logvar) per layer; weights stored in
    # (in_features, out_features) layout (lane-dense for the kernel).
    dims = [(D_IN, D_H1), (D_H1, D_H2), (D_H2, D_OUT)]
    params = []
    pkeys = jax.random.split(k_p, 2 * len(dims))
    for i, (fan_in, fan_out) in enumerate(dims):
        w_mu = jax.random.normal(pkeys[2 * i], (fan_in, fan_out),
                                 jnp.float32) / jnp.sqrt(float(fan_in))
        b_mu = jax.random.normal(pkeys[2 * i + 1], (fan_out,), jnp.float32) * 0.05
        w_logvar = jnp.full((fan_in, fan_out), -9.0, jnp.float32)
        b_logvar = jnp.full((fan_out,), -9.0, jnp.float32)
        params.append((w_mu, w_logvar, b_mu, b_logvar))

    out, kl = linear_layers_forward(x, input_dnu, params, k_eps)
    out = jax.block_until_ready(out)
    kl = jax.block_until_ready(kl)

    ref_out, ref_kl = ref_forward(x, input_dnu, params, k_eps)
    assert out.shape == (B, D_OUT), out.shape
    assert jnp.allclose(out, ref_out, atol=2e-2, rtol=2e-2), "output mismatch vs reference"
    assert jnp.allclose(kl, ref_kl, atol=1e-3, rtol=1e-5), "kl mismatch vs reference"

    print("KERNEL_OK")
</pallas_src>

<mosaic_0001>
module attributes {stable_mosaic.version = 11 : i64} {
  func.func @linear_layers_kernel(%arg0: i32, %arg1: memref<8x1024xbf16, #tpu.memory_space<vmem>>, %arg2: memref<1024x512xbf16, #tpu.memory_space<vmem>>, %arg3: memref<1x512xf32, #tpu.memory_space<vmem>>, %arg4: memref<512x64xf32, #tpu.memory_space<vmem>>, %arg5: memref<1x64xf32, #tpu.memory_space<vmem>>, %arg6: memref<8x1xf32, #tpu.memory_space<vmem>>, %arg7: memref<64x2xf32, #tpu.memory_space<vmem>>, %arg8: memref<1x2xf32, #tpu.memory_space<vmem>>, %arg9: memref<8x2xf32, #tpu.memory_space<vmem>>, %arg10: memref<8x512xf32, #tpu.memory_space<vmem>>) attributes {dimension_semantics = [#tpu.dimension_semantics<arbitrary>], iteration_bounds = array<i64: 4>, scalar_prefetch = 0 : i64, scratch_operands = 1 : i64, tpu.core_type = #tpu.core_type<tc>, window_params = [{transform_indices = @transform_0, window_bounds = array<i64: 8, 1024>}, {transform_indices = @transform_1, window_bounds = array<i64: 1024, 512>}, {pipeline_mode = #tpu.pipeline_mode<synchronous>, transform_indices = @transform_2, window_bounds = array<i64: 1, 512>}, {pipeline_mode = #tpu.pipeline_mode<synchronous>, transform_indices = @transform_3, window_bounds = array<i64: 512, 64>}, {pipeline_mode = #tpu.pipeline_mode<synchronous>, transform_indices = @transform_4, window_bounds = array<i64: 1, 64>}, {pipeline_mode = #tpu.pipeline_mode<synchronous>, transform_indices = @transform_5, window_bounds = array<i64: 8, 1>}, {pipeline_mode = #tpu.pipeline_mode<synchronous>, transform_indices = @transform_6, window_bounds = array<i64: 64, 2>}, {pipeline_mode = #tpu.pipeline_mode<synchronous>, transform_indices = @transform_7, window_bounds = array<i64: 1, 2>}, {pipeline_mode = #tpu.pipeline_mode<synchronous>, transform_indices = @transform_8, window_bounds = array<i64: 8, 2>}]} {
    %c0_i32 = arith.constant 0 : i32
    %0 = arith.cmpi eq, %arg0, %c0_i32 : i32
    %1 = arith.extui %0 : i1 to i32
    %c0_i32_0 = arith.constant 0 : i32
    %2 = arith.cmpi ne, %1, %c0_i32_0 : i32
    scf.if %2 {
      %cst_9 = arith.constant 0.000000e+00 : f32
      %12 = vector.broadcast %cst_9 : f32 to vector<8x512xf32>
      %c0_10 = arith.constant 0 : index
      %c0_11 = arith.constant 0 : index
      %13 = vector.load %arg10[%c0_10, %c0_11] : memref<8x512xf32, #tpu.memory_space<vmem>>, vector<8x512xf32>
      tpu.vector_store %arg10[%c0_10, %c0_11], %12 {strides = array<i32>} : memref<8x512xf32, #tpu.memory_space<vmem>>, vector<8x512xf32>,
    } else {
    }
    %c0 = arith.constant 0 : index
    %c0_1 = arith.constant 0 : index
    %3 = vector.load %arg10[%c0, %c0_1] : memref<8x512xf32, #tpu.memory_space<vmem>>, vector<8x512xf32>
    %c0_2 = arith.constant 0 : index
    %c0_3 = arith.constant 0 : index
    %4 = vector.load %arg1[%c0_2, %c0_3] : memref<8x1024xbf16, #tpu.memory_space<vmem>>, vector<8x1024xbf16>
    %c0_4 = arith.constant 0 : index
    %c0_5 = arith.constant 0 : index
    %5 = vector.load %arg2[%c0_4, %c0_5] : memref<1024x512xbf16, #tpu.memory_space<vmem>>, vector<1024x512xbf16>
    %cst = arith.constant dense<0.000000e+00> : vector<8x512xf32>
    %6 = tpu.matmul %4, %5, %cst {dimension_numbers = #tpu.dot_dimension_numbers<[1], [0], [0], [1], [0, 0, 1, 1], [], []>} : vector<8x1024xbf16>, vector<1024x512xbf16>, vector<8x512xf32> -> vector<8x512xf32>
    %7 = arith.addf %3, %6 : vector<8x512xf32>
    %c0_6 = arith.constant 0 : index
    %c0_7 = arith.constant 0 : index
    %8 = vector.load %arg10[%c0_6, %c0_7] : memref<8x512xf32, #tpu.memory_space<vmem>>, vector<8x512xf32>
    tpu.vector_store %arg10[%c0_6, %c0_7], %7 {strides = array<i32>} : memref<8x512xf32, #tpu.memory_space<vmem>>, vector<8x512xf32>,
    %c3_i32 = arith.constant 3 : i32
    %9 = arith.cmpi eq, %arg0, %c3_i32 : i32
    %10 = arith.extui %9 : i1 to i32
    %c0_i32_8 = arith.constant 0 : i32
    %11 = arith.cmpi ne, %10, %c0_i32_8 : i32
    scf.if %11 {
      %c0_9 = arith.constant 0 : index
      %c0_10 = arith.constant 0 : index
      %12 = vector.load %arg10[%c0_9, %c0_10] : memref<8x512xf32, #tpu.memory_space<vmem>>, vector<8x512xf32>
      %c0_11 = arith.constant 0 : index
      %c0_12 = arith.constant 0 : index
      %13 = vector.load %arg3[%c0_11, %c0_12] : memref<1x512xf32, #tpu.memory_space<vmem>>, vector<1x512xf32>
      %14 = vector.broadcast %13 : vector<1x512xf32> to vector<8x512xf32>
      %15 = arith.addf %12, %14 : vector<8x512xf32>
      %cst_13 = arith.constant 0.000000e+00 : f32
      %16 = vector.broadcast %cst_13 : f32 to vector<8x512xf32>
      %17 = arith.maximumf %15, %16 : vector<8x512xf32>
      %18 = math.absf %15 : vector<8x512xf32>
      %cst_14 = arith.constant 0.000000e+00 : f32
      %19 = vector.broadcast %cst_14 : f32 to vector<8x512xf32>
      %20 = arith.subf %19, %18 : vector<8x512xf32>
      %21 = math.exp %20 : vector<8x512xf32>
      %22 = math.log1p %21 : vector<8x512xf32>
      %23 = arith.addf %17, %22 : vector<8x512xf32>
      %c0_15 = arith.constant 0 : index
      %c0_16 = arith.constant 0 : index
      %24 = vector.load %arg4[%c0_15, %c0_16] : memref<512x64xf32, #tpu.memory_space<vmem>>, vector<512x64xf32>
      %cst_17 = arith.constant dense<0.000000e+00> : vector<8x64xf32>
      %25 = tpu.matmul %23, %24, %cst_17 {dimension_numbers = #tpu.dot_dimension_numbers<[1], [0], [0], [1], [0, 0, 1, 1], [], []>} : vector<8x512xf32>, vector<512x64xf32>, vector<8x64xf32> -> vector<8x64xf32>
      %c0_18 = arith.constant 0 : index
      %c0_19 = arith.constant 0 : index
      %26 = vector.load %arg5[%c0_18, %c0_19] : memref<1x64xf32, #tpu.memory_space<vmem>>, vector<1x64xf32>
      %27 = vector.broadcast %26 : vector<1x64xf32> to vector<8x64xf32>
      %28 = arith.addf %25, %27 : vector<8x64xf32>
      %cst_20 = arith.constant 0.000000e+00 : f32
      %29 = vector.broadcast %cst_20 : f32 to vector<8x64xf32>
      %30 = arith.maximumf %28, %29 : vector<8x64xf32>
      %31 = math.absf %28 : vector<8x64xf32>
      %cst_21 = arith.constant 0.000000e+00 : f32
      %32 = vector.broadcast %cst_21 : f32 to vector<8x64xf32>
      %33 = arith.subf %32, %31 : vector<8x64xf32>
      %34 = math.exp %33 : vector<8x64xf32>
      %35 = math.log1p %34 : vector<8x64xf32>
      %36 = arith.addf %30, %35 : vector<8x64xf32>
      %c0_22 = arith.constant 0 : index
      %c0_23 = arith.constant 0 : index
      %37 = vector.load %arg6[%c0_22, %c0_23] : memref<8x1xf32, #tpu.memory_space<vmem>>, vector<8x1xf32>
      %38 = vector.broadcast %37 : vector<8x1xf32> to vector<8x64xf32>
      %39 = arith.addf %36, %38 : vector<8x64xf32>
      %c0_24 = arith.constant 0 : index
      %c0_25 = arith.constant 0 : index
      %40 = vector.load %arg7[%c0_24, %c0_25] : memref<64x2xf32, #tpu.memory_space<vmem>>, vector<64x2xf32>
      %cst_26 = arith.constant dense<0.000000e+00> : vector<8x2xf32>
      %41 = tpu.matmul %39, %40, %cst_26 {dimension_numbers = #tpu.dot_dimension_numbers<[1], [0], [0], [1], [0, 0, 1, 1], [], []>} : vector<8x64xf32>, vector<64x2xf32>, vector<8x2xf32> -> vector<8x2xf32>
      %c0_27 = arith.constant 0 : index
      %c0_28 = arith.constant 0 : index
      %42 = vector.load %arg8[%c0_27, %c0_28] : memref<1x2xf32, #tpu.memory_space<vmem>>, vector<1x2xf32>
      %43 = vector.broadcast %42 : vector<1x2xf32> to vector<8x2xf32>
      %44 = arith.addf %41, %43 : vector<8x2xf32>
      %c0_29 = arith.constant 0 : index
      %c0_30 = arith.constant 0 : index
      %45 = vector.load %arg9[%c0_29, %c0_30] : memref<8x2xf32, #tpu.memory_space<vmem>>, vector<8x2xf32>
      tpu.vector_store %arg9[%c0_29, %c0_30], %44 {strides = array<i32>} : memref<8x2xf32, #tpu.memory_space<vmem>>, vector<8x2xf32>,
    } else {
    }
    return
  }
  func.func @transform_0(%arg0: i32) -> (i32, i32) {
    %c0_i32 = arith.constant 0 : i32
    %c0_i32_0 = arith.constant 0 : i32
    return %c0_i32, %arg0 : i32, i32
  }
  func.func @transform_1(%arg0: i32) -> (i32, i32) {
    %c0_i32 = arith.constant 0 : i32
    %c0_i32_0 = arith.constant 0 : i32
    return %arg0, %c0_i32 : i32, i32
  }
  func.func @transform_2(%arg0: i32) -> (i32, i32) {
    %c0_i32 = arith.constant 0 : i32
    %c0_i32_0 = arith.constant 0 : i32
    %c0_i32_1 = arith.constant 0 : i32
    return %c0_i32, %c0_i32_0 : i32, i32
  }
  func.func @transform_3(%arg0: i32) -> (i32, i32) {
    %c0_i32 = arith.constant 0 : i32
    %c0_i32_0 = arith.constant 0 : i32
    %c0_i32_1 = arith.constant 0 : i32
    return %c0_i32, %c0_i32_0 : i32, i32
  }
  func.func @transform_4(%arg0: i32) -> (i32, i32) {
    %c0_i32 = arith.constant 0 : i32
    %c0_i32_0 = arith.constant 0 : i32
    %c0_i32_1 = arith.constant 0 : i32
    return %c0_i32, %c0_i32_0 : i32, i32
  }
  func.func @transform_5(%arg0: i32) -> (i32, i32) {
    %c0_i32 = arith.constant 0 : i32
    %c0_i32_0 = arith.constant 0 : i32
    %c0_i32_1 = arith.constant 0 : i32
    return %c0_i32, %c0_i32_0 : i32, i32
  }
  func.func @transform_6(%arg0: i32) -> (i32, i32) {
    %c0_i32 = arith.constant 0 : i32
    %c0_i32_0 = arith.constant 0 : i32
    %c0_i32_1 = arith.constant 0 : i32
    return %c0_i32, %c0_i32_0 : i32, i32
  }
  func.func @transform_7(%arg0: i32) -> (i32, i32) {
    %c0_i32 = arith.constant 0 : i32
    %c0_i32_0 = arith.constant 0 : i32
    %c0_i32_1 = arith.constant 0 : i32
    return %c0_i32, %c0_i32_0 : i32, i32
  }
  func.func @transform_8(%arg0: i32) -> (i32, i32) {
    %c0_i32 = arith.constant 0 : i32
    %c0_i32_0 = arith.constant 0 : i32
    %c0_i32_1 = arith.constant 0 : i32
    return %c0_i32, %c0_i32_0 : i32, i32
  }
}

</mosaic_0001>

<bundles_post_ra>
// kernel: tpu_custom_call.1
= control target key start
LH: loop header
LB: loop body
LE: loop exit
PB: predicated region body
PF: predicated region fallthrough
CT: control target
= control target key end

     0   :  { %s4827_s0 = inlined_call_operand.hbm [shape: bf16[8,4096], index: 0, kind: input, shape index: {}]   ;;  %s4828_s1 = inlined_call_operand.hbm [shape: bf16[4096,512], index: 1, kind: input, shape index: {}]   ;;  %s4829_s2 = inlined_call_operand.hbm [shape: f32[1,512], index: 2, kind: input, shape index: {}]   ;;  %s4830_s3 = inlined_call_operand.vmem [shape: f32[512,64], index: 3, kind: input, shape index: {}]   ;;  %s4831_s4 = inlined_call_operand.hbm [shape: f32[1,64], index: 4, kind: input, shape index: {}]   ;;  %s4832_s5 = inlined_call_operand.vmem [shape: f32[8,1], index: 5, kind: input, shape index: {}]   ;;  %s4833_s6 = inlined_call_operand.vmem [shape: f32[64,2], index: 6, kind: input, shape index: {}]   ;;  %s4834_s7 = inlined_call_operand.hbm [shape: f32[1,2], index: 7, kind: input, shape index: {}]   ;;  %s4835_s8 = inlined_call_operand.vmem [shape: f32[8,2], index: 8, kind: output, shape index: {}]  }
   0x1   :  { %4839 = sst [smem:[#allocation15_spill]] %s4827_s0 }
   0x2   :  { %13 = vsyncpa [#allocation4], 0 }
   0x3   :  { %15 = vsyncpa [#allocation4 + $0x1], 0 }
   0x4   :  { %16 = vsyncpa [#allocation6], 0 }
   0x5   :  { %18 = vsyncpa [#allocation6 + $0x1], 0 }
   0x6   :  { %19 = vsyncpa [#allocation9], 0  ;;  %s4024_s27 = smov 0   ;;  %s4026_s28 = smov 0  }
   0x7   :  { %s4028_s29 = smov 0   ;;  %s4030_s30 = smov 0  }
   0x8 LB: > { %s4043_s9 = sadd.s32 4294967295, %s3965_s30   ;;  %p45_p0 = scmp.ne.s32.totalorder %s3957_s28, %s3953_s27  ;;  %s3965_s30 = sphi %s4030_s30, %s4858_s30   ;;  %s3961_s29 = sphi %s4028_s29, %s4857_s29   ;;  %s3957_s28 = sphi %s4026_s28, %s4856_s28   ;;  %s3953_s27 = sphi %s4024_s27, %s4855_s27  }
   0x9   : > { %p4836_p1 = scmp.eq.s32.totalorder %s4043_s9, 0  ;;  %p2814_p2 = scmp.ge.s32.totalorder %s3965_s30, 1 }
   0xa   : > { %p229_p3 = scmp.lt.s32.totalorder %s3965_s30, 5  ;;  %s3967_s12 = smov [#allocation7]  }
   0xb   : > { %p4052_p5 = por %p4836_p1, %p45_p0  ;;  %s242_s13 = sshll.u32 %s3967_s12, 4  ;;  %s243_s13 = int_to_ptr.vmem [resolvable:$true] %s242_s13 }
   0xc   : > { %p4056_p6 = pnand %p2814_p2, %p229_p3  ;;  %s3968_s14 = smov [#allocation8]  }
   0xd   : > { %s4840_s10 = scalar_select %p4052_p5, 1, 0 }
   0xe   : > { %s4841_s11 = scalar_select %p4056_p6, 1, 0 }
   0xf   : > { %p3296_p7 = pneg %p4056_p6  ;;  %s256_s15 = sshll.u32 %s3968_s14, 4  ;;  %s4068_s15 = int_to_ptr.vmem [resolvable:$true] %s256_s15 }
  0x10   : > { %s3969_s17 = smov [#allocation10]   ;;  %s3775_s21 = scalar_lea.hbm %s4829_s2, 64 }
  0x11   : > { %p4064_p8 = pnand %p3296_p7, %p4836_p1  ;;  %s273_s18 = sshll.u32 %s3969_s17, 4  ;;  %s4070_s18 = int_to_ptr.vmem [resolvable:$true] %s273_s18 }
  0x12   : > { %p3776_p9 = scmp.ne.s32.totalorder %s4829_s2, %s3775_s21  ;;  %p3782_p13 = scmp.lt.u32.totalorder %s3775_s21, %s4829_s2 }
  0x13   : > { %p4080_p10 = pneg %p4064_p8 }
  0x15   : > { %p3778_p11 = pnand %p4080_p10, %p3776_p9 }
  0x17   : > { %p3779_p12 = pneg %p3778_p11 }
  0x19   : > { %p3784_p0 = pnand %p3782_p13, %p3779_p12 }
  0x1b   : > { %3787 = shalt.err (!%p3784_p0)
}
  0x1c   : > { %s3788_s27 = scalar_lea.vmem %s243_s13, 64  ;;  %p3796_p4 = scmp.lt.s32.totalorder %s243_s13, %s243_s13 }
  0x1d   : > { %p3789_p2 = scmp.ne.s32.totalorder %s243_s13, %s3788_s27  ;;  %p3797_p1 = scmp.lt.s32.totalorder %s3788_s27, %s3788_s27 }
  0x1f   : > { %p3791_p3 = pnand %p3789_p2, %p4080_p10  ;;  %p3798_p5 = por %p3797_p1, %p3796_p4 }
  0x21   : > { %p3792_p7 = pneg %p3791_p3 }
  0x23   : > { %p3799_p6 = pnand %p3798_p5, %p3792_p7 }
  0x25   : > { %3802 = shalt.err (!%p3799_p6)
}
  0x26   : > { %3299 = dma.hbm_to_vmem [thread:$0]  (!%p4064_p8), %s4829_s2, 64, %s243_s13, [#allocation6]  }
  0x27   : > { %s3803_s20 = scalar_lea.hbm %s4831_s4, 16 }
  0x28   : > { %p3804_p9 = scmp.ne.s32.totalorder %s4831_s4, %s3803_s20  ;;  %p3810_p4 = scmp.lt.u32.totalorder %s3803_s20, %s4831_s4 }
  0x2a   : > { %p3806_p11 = pnand %p3804_p9, %p4080_p10 }
  0x2c   : > { %p3807_p1 = pneg %p3806_p11 }
  0x2e   : > { %p3812_p5 = pnand %p3810_p4, %p3807_p1 }
  0x30   : > { %3815 = shalt.err (!%p3812_p5)
}
  0x31   : > { %s3816_s13 = scalar_lea.vmem %s4068_s15, 16  ;;  %s3823_s26 = scalar_lea.vmem %s4068_s15, 32 }
  0x32   : > { %p3817_p6 = scmp.ne.s32.totalorder %s4068_s15, %s3816_s13  ;;  %p3824_p0 = scmp.lt.s32.totalorder %s4068_s15, %s4068_s15 }
  0x33   : > { %p3825_p2 = scmp.lt.s32.totalorder %s3823_s26, %s3816_s13 }
  0x34   : > { %p3819_p12 = pnand %p3817_p6, %p4080_p10 }
  0x35   : > { %p3826_p3 = por %p3825_p2, %p3824_p0 }
  0x36   : > { %p3820_p13 = pneg %p3819_p12 }
  0x38   : > { %p3827_p7 = pnand %p3826_p3, %p3820_p13 }
  0x3a   : > { %3830 = shalt.err (!%p3827_p7)
}
  0x3b   : > { %3302 = dma.hbm_to_vmem [thread:$0]  (!%p4064_p8), %s4831_s4, 16, %s4068_s15, [#allocation9]  }
  0x3c   : > { %s3831_s19 = scalar_lea.hbm %s4834_s7, 16 }
  0x3d   : > { %p3832_p9 = scmp.ne.s32.totalorder %s4834_s7, %s3831_s19  ;;  %p3838_p4 = scmp.lt.u32.totalorder %s3831_s19, %s4834_s7 }
  0x3f   : > { %p3834_p11 = pnand %p3832_p9, %p4080_p10 }
  0x41   : > { %p3835_p1 = pneg %p3834_p11 }
  0x43   : > { %p3840_p5 = pnand %p3838_p4, %p3835_p1 }
  0x45   : > { %3843 = shalt.err (!%p3840_p5)
}
  0x46   : > { %s3844_s15 = scalar_lea.vmem %s4070_s18, 16  ;;  %s3851_s25 = scalar_lea.vmem %s4070_s18, 32 }
  0x47   : > { %p3845_p6 = scmp.ne.s32.totalorder %s4070_s18, %s3844_s15  ;;  %p3852_p0 = scmp.lt.s32.totalorder %s4070_s18, %s4070_s18 }
  0x48   : > { %p3853_p2 = scmp.lt.s32.totalorder %s3851_s25, %s3844_s15 }
  0x49   : > { %p3847_p12 = pnand %p3845_p6, %p4080_p10 }
  0x4a   : > { %p3854_p3 = por %p3853_p2, %p3852_p0 }
  0x4b   : > { %p3848_p13 = pneg %p3847_p12 }
  0x4d   : > { %p3855_p7 = pnand %p3854_p3, %p3848_p13 }
  0x4f   : > { %3858 = shalt.err (!%p3855_p7)
}
  0x50   : > { %3305 = dma.hbm_to_vmem [thread:$0]  (!%p4064_p8), %s4834_s7, 16, %s4070_s18, [#allocation9]  }
  0x51   : > { %s4145_s24 = sadd.s32 1, %s3965_s30   ;;  %s32_s16 = sadd.s32 1, %s3961_s29 }
  0x52   : > { %s29_s27 = ssub.s32 %s3965_s30, %s4145_s24  ;;  %p39_p9 = scmp.ne.s32.totalorder %s3961_s29, %s3957_s28 }
  0x53   : > { %p30_p10 = scmp.eq.s32.totalorder %s29_s27, 0  ;;  %p40_p11 = scmp.eq.s32.totalorder %s3965_s30, 0 }
  0x54   : > { %p3316_p1 = scmp.lt.s32.totalorder %s3965_s30, 4  ;;  %s4158_s14 = sand.u32 1, %s3961_s29  }
  0x55   : > { %s4155_s12 = scalar_select %p30_p10, %s3961_s29, %s32_s16  }
  0x56   : > { %p41_p4 = por %p40_p11, %p39_p9  ;;  %s2819_s17 = sshll.u32 %s4158_s14, 5 }
  0x57   : > { %s3103_s18 = sshll.u32 %s3965_s30, 9  ;;  %s4844_s0 = sld [smem:[#allocation15_spill]] }
  0x58   : > { %s288_s22 = scalar_lea.vmem [#allocation3], %s2819_s17  ;;  %p4169_p8 = pnand %p3316_p1, %p41_p4 }
  0x59   : > { %s296_s23 = sshll.u32 %s288_s22, 4  ;;  %s2822_s25 = sshll.u32 %s4158_s14, 11  ;;  %s4167_s23 = int_to_ptr.vmem [resolvable:$true] %s296_s23 }
  0x5a   : > { %s303_s13 = sand.u32 1, %s3965_s30   ;;  %s285_s26 = scalar_lea.sflag [#allocation4], %s4158_s14 }
  0x5b   : > { %p3861_p6 = pneg %p4169_p8 }
  0x5d   : > { %s4165_s21 = scalar_lea.hbm %s4844_s0, %s3103_s18  ;;  %s3864_s18 = scalar_lea.hbm %s4844_s0, 2048 }
  0x5e   : > { %s3859_s27 = scalar_lea.hbm %s4165_s21, 512  ;;  %p3865_p0 = scmp.lt.u32.totalorder %s4165_s21, %s4844_s0 }
  0x5f   : > { %p3860_p5 = scmp.ne.s32.totalorder %s4165_s21, %s3859_s27  ;;  %p3866_p2 = scmp.lt.u32.totalorder %s3864_s18, %s3859_s27 }
  0x60   : > { %p3868_p7 = scmp.lt.u32.totalorder %s3859_s27, %s4165_s21 }
  0x61   : > { %p3862_p12 = pnand %p3861_p6, %p3860_p5  ;;  %p3867_p3 = por %p3866_p2, %p3865_p0 }
  0x63   : > { %p3863_p13 = pneg %p3862_p12  ;;  %p3869_p10 = por %p3868_p7, %p3867_p3 }
  0x65   : > { %p3870_p9 = pnand %p3869_p10, %p3863_p13 }
  0x67   : > { %3873 = shalt.err (!%p3870_p9)
}
  0x68   : > { %s3874_s22 = scalar_lea.vmem %s4167_s23, 512  ;;  %s3970_s16 = smov [#allocation3]  }
  0x69   : > { %p3875_p11 = scmp.ne.s32.totalorder %s4167_s23, %s3874_s22  ;;  %s3879_s17 = sshll.u32 %s3970_s16, 4  ;;  %s3880_s17 = int_to_ptr.vmem [resolvable:$false] %s3879_s17 }
  0x6a   : > { %s3881_s19 = scalar_lea.vmem %s3880_s17, 1024  ;;  %p3882_p5 = scmp.lt.s32.totalorder %s4167_s23, %s3880_s17 }
  0x6b   : > { %p3877_p1 = pnand %p3875_p11, %p3861_p6  ;;  %p3883_p12 = scmp.lt.s32.totalorder %s3881_s19, %s3874_s22 }
  0x6d   : > { %p3878_p4 = pneg %p3877_p1  ;;  %p3884_p0 = por %p3883_p12, %p3882_p5 }
  0x6f   : > { %p3885_p2 = pnand %p3884_p0, %p3878_p4 }
  0x71   : > { %3888 = shalt.err (!%p3885_p2)
}
  0x72   : > { %3309 = dma.hbm_to_vmem [thread:$0]  (!%p4169_p8), %s4165_s21, 512, %s4167_s23, %s285_s26  }
  0x73   : > { %s307_s27 = scalar_lea.vmem [#allocation5], %s2822_s25  ;;  %s3105_s20 = sshll.u32 %s3965_s30, 15 }
  0x74   : > { %s315_s18 = sshll.u32 %s307_s27, 4  ;;  %s4209_s17 = scalar_lea.hbm %s4828_s1, %s3105_s20  ;;  %s4203_s18 = int_to_ptr.vmem [resolvable:$true] %s315_s18 }
  0x75   : > { %s4213_s19 = scalar_lea.sflag [#allocation6], %s303_s13  ;;  %s3889_s0 = scalar_lea.hbm %s4209_s17, 32768 }
  0x76   : > { %p3890_p13 = scmp.ne.s32.totalorder %s4209_s17, %s3889_s0  ;;  %s3894_s23 = scalar_lea.hbm %s4828_s1, 131072 }
  0x77   : > { %p3895_p10 = scmp.lt.u32.totalorder %s4209_s17, %s4828_s1  ;;  %p3896_p9 = scmp.lt.u32.totalorder %s3894_s23, %s3889_s0 }
  0x78   : > { %p3892_p3 = pnand %p3890_p13, %p3861_p6  ;;  %p3898_p1 = scmp.lt.u32.totalorder %s3889_s0, %s4209_s17 }
  0x79   : > { %p3897_p11 = por %p3896_p9, %p3895_p10 }
  0x7a   : > { %p3893_p7 = pneg %p3892_p3 }
  0x7b   : > { %p3899_p4 = por %p3898_p1, %p3897_p11 }
  0x7d   : > { %p3900_p5 = pnand %p3899_p4, %p3893_p7 }
  0x7f   : > { %3903 = shalt.err (!%p3900_p5)
}
  0x80   : > { %s3904_s30 = scalar_lea.vmem %s4203_s18, 32768  ;;  %s3971_s13 = smov [#allocation5]  }
  0x81   : > { %p3905_p12 = scmp.ne.s32.totalorder %s4203_s18, %s3904_s30  ;;  %s3909_s27 = sshll.u32 %s3971_s13, 4  ;;  %s3910_s27 = int_to_ptr.vmem [resolvable:$false] %s3909_s27 }
  0x82   : > { %s3911_s20 = scalar_lea.vmem %s3910_s27, 65536  ;;  %p3912_p13 = scmp.lt.s32.totalorder %s4203_s18, %s3910_s27 }
  0x83   : > { %p3907_p0 = pnand %p3905_p12, %p3861_p6  ;;  %p3913_p3 = scmp.lt.s32.totalorder %s3911_s20, %s3904_s30 }
  0x85   : > { %p3908_p2 = pneg %p3907_p0  ;;  %p3914_p10 = por %p3913_p3, %p3912_p13 }
  0x87   : > { %p3915_p9 = pnand %p3914_p10, %p3908_p2 }
  0x89   : > { %3918 = shalt.err (!%p3915_p9)
}
  0x8a   : > { %s3972_s0 = smov 256   ;;  %s3973_s16 = smov 16  }
  0x8b   : > { %3312 = dma.hbm_to_vmem [thread:$0]  (!%p4169_p8), %s4209_s17, 32768, %s4203_s18, %s4213_s19, %s3972_s0, %s3972_s0, %s3973_s16  }
  0x8c   : > { %p4846_p6 = scmp.ne.s32.totalorder %s4841_s11, 0 }
  0x8d   : > { %s329_s22 = sand.u32 (!%p4846_p6), 1, %s3957_s28   ;;  %p4847_p7 = scmp.ne.s32.totalorder (!%p4846_p6), %s4840_s10, 0 }
  0x8e   : > { %327 = sbr.rel (%p4846_p6) target bundleno = 1159 (0x487), region = 52  ;;  %s2827_s14 = sshll.u32 (!%p4846_p6), %s329_s22, 5 }
  0x8f   : > { %s330_s21 = scalar_lea.sflag (!%p4846_p6), [#allocation4], %s329_s22  ;;  %s4242_s23 = scalar_lea.vmem (!%p4846_p6), [#allocation3], %s2827_s14 }
  0x95   : > { %3936 = dma.done.wait (%p4847_p7), %s330_s21, 512  }
  0x96   : > { %3938 = vsyncadd (%p4847_p7), %s330_s21, 4294966784  ;;  %s338_s25 = sand.u32 1, %s4043_s9   ;;  %s2828_s15 = sshll.u32 %s329_s22, 11 }
  0x97   : > { %s339_s18 = scalar_lea.sflag [#allocation6], %s338_s25  ;;  %s4249_s17 = scalar_lea.vmem [#allocation5], %s2828_s15 }
  0x98   : > { %3940 = dma.done.wait (%p4847_p7), %s339_s18, 32768  }
  0x99   : > { %3942 = vsyncadd (%p4847_p7), %s339_s18, 4294934528  ;;  %p4848_p8 = scmp.eq.s32.totalorder %s4043_s9, 0 }
  0x9b   : > { %3944 = dma.done.wait (%p4848_p8), [#allocation6], 64   ;;  %p4849_p11 = pmov %p4848_p8 }
  0x9c   : > { %p4850_p1 = pmov %p4848_p8 }
  0x9d   : > { %3946 = vsyncadd (%p4849_p11), [#allocation6], 4294967232 }
  0x9e   : > { %3948 = dma.done.wait (%p4850_p1), [#allocation9], 32   ;;  %p4851_p4 = pmov %p4850_p1 }
  0x9f   : > { %p4852_p5 = scmp.ne.s32.totalorder %s4043_s9, 0 }
  0xa0   : > { %3950 = vsyncadd (%p4851_p4), [#allocation9], 4294967264  ;;  %v3974_v0 = vmov (!%p4852_p5), 0.0  }
  0xa1   : > { %392 = sbr.rel (%p4852_p5) target bundleno = 168 (0xa8), region = 76  ;;  %393 = vst [vmem:[#allocation2] sm:$0xff] (!%p4852_p5), %v3974_v0  ;;  %394 = vst [vmem:[#allocation2 + $0x8] sm:$0xff] (!%p4852_p5), %v3974_v0 }
  0xa2   : > { %395 = vst [vmem:[#allocation2 + $0x10] sm:$0xff] (!%p4852_p5), %v3974_v0  ;;  %396 = vst [vmem:[#allocation2 + $0x18] sm:$0xff] (!%p4852_p5), %v3974_v0 }
  0xa8 PF: > { %v3362_v1 = vld [vmem:[%s4249_s17 + $0x4] ss:$16 sps:$4 sm:$0xff]   ;;  %v3366_v3 = vld [vmem:[%s4249_s17] ss:$16 sps:$4 sm:$0xff]   ;;  %v402_v49 = vld [vmem:[%s4242_s23 + $0x8] sm:$0xff]  ;;  %p3097_p12 = scmp.ne.s32.totalorder %s4043_s9, 3 }
  0xa9   : > { %v3364_v2 = vld [vmem:[%s4249_s17 + $0x204] ss:$16 sps:$4 sm:$0xff]   ;;  %1969 = vmatprep.subr.bf16.mxu0 %v3362_v1  ;;  %v3367_v4 = vld [vmem:[%s4249_s17 + $0x200] ss:$16 sps:$4 sm:$0xff]   ;;  %v4317_v52 = vcombine.high %v402_v49, %v402_v49  ;;  %vm3977_vm4 = vmmov (!%p3097_p12), 0   ;;  %vm2647_vm6 = vcmask (!%p3097_p12), 523264  }
  0xaa   : > { %2010 = vmatprep.subr.bf16.mxu1 %v3364_v2  ;;  %v3368_v5 = vld [vmem:[%s4249_s17 + $0x24] ss:$16 sps:$4 sm:$0xff]   ;;  %1970 = vmatpush1.bf16.msra.mxu0 %v3366_v3  ;;  %v3372_v7 = vld [vmem:[%s4249_s17 + $0x20] ss:$16 sps:$4 sm:$0xff]   ;;  %vm2721_vm7 = vcmask (!%p3097_p12), 15360  }
  0xab   : > { %2011 = vmatpush1.bf16.msra.mxu1 %v3367_v4  ;;  %v3370_v6 = vld [vmem:[%s4249_s17 + $0x224] ss:$16 sps:$4 sm:$0xff]   ;;  %1971 = vmatprep.subr.bf16.mxu0 %v3368_v5  ;;  %v3373_v8 = vld [vmem:[%s4249_s17 + $0x220] ss:$16 sps:$4 sm:$0xff]  }
  0xac   : > { %2012 = vmatprep.subr.bf16.mxu1 %v3370_v6  ;;  %v3374_v9 = vld [vmem:[%s4249_s17 + $0x44] ss:$16 sps:$4 sm:$0xff]   ;;  %v3378_v11 = vld [vmem:[%s4249_s17 + $0x40] ss:$16 sps:$4 sm:$0xff]   ;;  %2042 = vmatprep.mubr.bf16.mxu1 %v4317_v52 }
  0xad   : > { %v3376_v10 = vld [vmem:[%s4249_s17 + $0x244] ss:$16 sps:$4 sm:$0xff]   ;;  %v3379_v12 = vld [vmem:[%s4249_s17 + $0x240] ss:$16 sps:$4 sm:$0xff]  }
  0xae   : > { %1972 = vmatpush1.bf16.msra.mxu0 %v3372_v7  ;;  %v3380_v13 = vld [vmem:[%s4249_s17 + $0x64] ss:$16 sps:$4 sm:$0xff]   ;;  %v3384_v15 = vld [vmem:[%s4249_s17 + $0x60] ss:$16 sps:$4 sm:$0xff]  }
  0xaf   : > { %2013 = vmatpush1.bf16.msra.mxu1 %v3373_v8  ;;  %1973 = vmatprep.subr.bf16.mxu0 %v3374_v9  ;;  %v3382_v14 = vld [vmem:[%s4249_s17 + $0x264] ss:$16 sps:$4 sm:$0xff]   ;;  %v3385_v16 = vld [vmem:[%s4249_s17 + $0x260] ss:$16 sps:$4 sm:$0xff]   ;;  %v4341_v8 = vcombine.low %v402_v49, %v402_v49 }
  0xb0   : > { %2014 = vmatprep.subr.bf16.mxu1 %v3376_v10  ;;  %v3386_v17 = vld [vmem:[%s4249_s17 + $0x84] ss:$16 sps:$4 sm:$0xff]   ;;  %v3390_v19 = vld [vmem:[%s4249_s17 + $0x80] ss:$16 sps:$4 sm:$0xff]  }
  0xb1   : > { %v3388_v18 = vld [vmem:[%s4249_s17 + $0x284] ss:$16 sps:$4 sm:$0xff]   ;;  %v3391_v20 = vld [vmem:[%s4249_s17 + $0x280] ss:$16 sps:$4 sm:$0xff]  }
  0xb2   : > { %1974 = vmatpush1.bf16.msra.mxu0 %v3378_v11  ;;  %v3392_v21 = vld [vmem:[%s4249_s17 + $0xa4] ss:$16 sps:$4 sm:$0xff]   ;;  %v3396_v23 = vld [vmem:[%s4249_s17 + $0xa0] ss:$16 sps:$4 sm:$0xff]  }
  0xb3   : > { %2015 = vmatpush1.bf16.msra.mxu1 %v3379_v12  ;;  %1975 = vmatprep.subr.bf16.mxu0 %v3380_v13  ;;  %v3394_v22 = vld [vmem:[%s4249_s17 + $0x2a4] ss:$16 sps:$4 sm:$0xff]   ;;  %v3397_v24 = vld [vmem:[%s4249_s17 + $0x2a0] ss:$16 sps:$4 sm:$0xff]  }
  0xb4   : > { %2016 = vmatprep.subr.bf16.mxu1 %v3382_v14  ;;  %v3398_v25 = vld [vmem:[%s4249_s17 + $0xc4] ss:$16 sps:$4 sm:$0xff]   ;;  %v3402_v27 = vld [vmem:[%s4249_s17 + $0xc0] ss:$16 sps:$4 sm:$0xff]  }
  0xb5   : > { %v3400_v26 = vld [vmem:[%s4249_s17 + $0x2c4] ss:$16 sps:$4 sm:$0xff]   ;;  %v3403_v28 = vld [vmem:[%s4249_s17 + $0x2c0] ss:$16 sps:$4 sm:$0xff]  }
  0xb6   : > { %1976 = vmatpush1.bf16.msra.mxu0 %v3384_v15  ;;  %v3404_v29 = vld [vmem:[%s4249_s17 + $0xe4] ss:$16 sps:$4 sm:$0xff]   ;;  %v3408_v31 = vld [vmem:[%s4249_s17 + $0xe0] ss:$16 sps:$4 sm:$0xff]  }
  0xb7   : > { %2017 = vmatpush1.bf16.msra.mxu1 %v3385_v16  ;;  %1977 = vmatprep.subr.bf16.mxu0 %v3386_v17  ;;  %v3406_v30 = vld [vmem:[%s4249_s17 + $0x2e4] ss:$16 sps:$4 sm:$0xff]   ;;  %v3409_v32 = vld [vmem:[%s4249_s17 + $0x2e0] ss:$16 sps:$4 sm:$0xff]  }
  0xb8   : > { %2018 = vmatprep.subr.bf16.mxu1 %v3388_v18  ;;  %v3410_v33 = vld [vmem:[%s4249_s17 + $0x104] ss:$16 sps:$4 sm:$0xff]   ;;  %v3414_v35 = vld [vmem:[%s4249_s17 + $0x100] ss:$16 sps:$4 sm:$0xff]  }
  0xb9   : > { %v3412_v34 = vld [vmem:[%s4249_s17 + $0x304] ss:$16 sps:$4 sm:$0xff]   ;;  %v3415_v36 = vld [vmem:[%s4249_s17 + $0x300] ss:$16 sps:$4 sm:$0xff]  }
  0xba   : > { %1978 = vmatpush1.bf16.msra.mxu0 %v3390_v19  ;;  %v3416_v37 = vld [vmem:[%s4249_s17 + $0x124] ss:$16 sps:$4 sm:$0xff]   ;;  %v3420_v39 = vld [vmem:[%s4249_s17 + $0x120] ss:$16 sps:$4 sm:$0xff]  }
  0xbb   : > { %2019 = vmatpush1.bf16.msra.mxu1 %v3391_v20  ;;  %1979 = vmatprep.subr.bf16.mxu0 %v3392_v21  ;;  %v3418_v38 = vld [vmem:[%s4249_s17 + $0x324] ss:$16 sps:$4 sm:$0xff]   ;;  %v3421_v40 = vld [vmem:[%s4249_s17 + $0x320] ss:$16 sps:$4 sm:$0xff]  }
  0xbc   : > { %2020 = vmatprep.subr.bf16.mxu1 %v3394_v22  ;;  %v3422_v41 = vld [vmem:[%s4249_s17 + $0x144] ss:$16 sps:$4 sm:$0xff]   ;;  %v3426_v43 = vld [vmem:[%s4249_s17 + $0x140] ss:$16 sps:$4 sm:$0xff]  }
  0xbd   : > { %v3424_v42 = vld [vmem:[%s4249_s17 + $0x344] ss:$16 sps:$4 sm:$0xff]   ;;  %v3427_v44 = vld [vmem:[%s4249_s17 + $0x340] ss:$16 sps:$4 sm:$0xff]  }
  0xbe   : > { %1980 = vmatpush1.bf16.msra.mxu0 %v3396_v23  ;;  %v3428_v45 = vld [vmem:[%s4249_s17 + $0x164] ss:$16 sps:$4 sm:$0xff]   ;;  %v3432_v50 = vld [vmem:[%s4249_s17 + $0x160] ss:$16 sps:$4 sm:$0xff]  }
  0xbf   : > { %2021 = vmatpush1.bf16.msra.mxu1 %v3397_v24  ;;  %1981 = vmatprep.subr.bf16.mxu0 %v3398_v25  ;;  %v3430_v46 = vld [vmem:[%s4249_s17 + $0x364] ss:$16 sps:$4 sm:$0xff]   ;;  %v3433_v51 = vld [vmem:[%s4249_s17 + $0x360] ss:$16 sps:$4 sm:$0xff]  }
  0xc0   : > { %2022 = vmatprep.subr.bf16.mxu1 %v3400_v26  ;;  %v401_v47 = vld [vmem:[%s4242_s23] sm:$0xff] }
  0xc1   : > { %v4312_v48 = vcombine.high %v401_v47, %v401_v47  ;;  %v3434_v53 = vld [vmem:[%s4249_s17 + $0x184] ss:$16 sps:$4 sm:$0xff]   ;;  %v3438_v55 = vld [vmem:[%s4249_s17 + $0x180] ss:$16 sps:$4 sm:$0xff]   ;;  %v4339_v7 = vcombine.low %v401_v47, %v401_v47 }
  0xc2   : > { %1982 = vmatpush1.bf16.msra.mxu0 %v3402_v27  ;;  %v3436_v54 = vld [vmem:[%s4249_s17 + $0x384] ss:$16 sps:$4 sm:$0xff]   ;;  %v3439_v56 = vld [vmem:[%s4249_s17 + $0x380] ss:$16 sps:$4 sm:$0xff]  }
  0xc3   : > { %2023 = vmatpush1.bf16.msra.mxu1 %v3403_v28  ;;  %1983 = vmatprep.subr.bf16.mxu0 %v3404_v29  ;;  %v3440_v57 = vld [vmem:[%s4249_s17 + $0x1a4] ss:$16 sps:$4 sm:$0xff]   ;;  %v3444_v59 = vld [vmem:[%s4249_s17 + $0x1a0] ss:$16 sps:$4 sm:$0xff]  }
  0xc4   : > { %2024 = vmatprep.subr.bf16.mxu1 %v3406_v30  ;;  %2001 = vmatprep.mubr.bf16.mxu0 %v4312_v48  ;;  %v3442_v58 = vld [vmem:[%s4249_s17 + $0x3a4] ss:$16 sps:$4 sm:$0xff]   ;;  %v3445_v60 = vld [vmem:[%s4249_s17 + $0x3a0] ss:$16 sps:$4 sm:$0xff]  }
  0xc5   : > { %v3446_v61 = vld [vmem:[%s4249_s17 + $0x1c4] ss:$16 sps:$4 sm:$0xff]   ;;  %v3450_v63 = vld [vmem:[%s4249_s17 + $0x1c0] ss:$16 sps:$4 sm:$0xff]  }
  0xc6   : > { %1984 = vmatpush1.bf16.msra.mxu0 %v3408_v31  ;;  %v3448_v62 = vld [vmem:[%s4249_s17 + $0x3c4] ss:$16 sps:$4 sm:$0xff]   ;;  %v3451_v0 = vld [vmem:[%s4249_s17 + $0x3c0] ss:$16 sps:$4 sm:$0xff]  }
  0xc7   : > { %2025 = vmatpush1.bf16.msra.mxu1 %v3409_v32  ;;  %1985 = vmatprep.subr.bf16.mxu0 %v3410_v33  ;;  %v3452_v1 = vld [vmem:[%s4249_s17 + $0x1e4] ss:$16 sps:$4 sm:$0xff]   ;;  %v3456_v3 = vld [vmem:[%s4249_s17 + $0x1e0] ss:$16 sps:$4 sm:$0xff]  }
  0xc8   : > { %2026 = vmatprep.subr.bf16.mxu1 %v3412_v34  ;;  %v3454_v2 = vld [vmem:[%s4249_s17 + $0x3e4] ss:$16 sps:$4 sm:$0xff]   ;;  %v3457_v4 = vld [vmem:[%s4249_s17 + $0x3e0] ss:$16 sps:$4 sm:$0xff]   ;;  %v4373_v34 = vld [vmem:[%s4242_s23 + $0x18] sm:$0xff] }
  0xc9   : > { %v3464_v5 = vld [vmem:[%s4249_s17 + $0x404] ss:$16 sps:$4 sm:$0xff]   ;;  %v3462_v9 = vld [vmem:[%s4249_s17 + $0x400] ss:$16 sps:$4 sm:$0xff]  }
  0xca   : > { %1986 = vmatpush1.bf16.msra.mxu0 %v3414_v35  ;;  %v3467_v6 = vld [vmem:[%s4249_s17 + $0x604] ss:$16 sps:$4 sm:$0xff]   ;;  %v3465_v10 = vld [vmem:[%s4249_s17 + $0x600] ss:$16 sps:$4 sm:$0xff]  }
  0xcb   : > { %2027 = vmatpush1.bf16.msra.mxu1 %v3415_v36  ;;  %1987 = vmatprep.subr.bf16.mxu0 %v3416_v37  ;;  %v3470_v11 = vld [vmem:[%s4249_s17 + $0x424] ss:$16 sps:$4 sm:$0xff]   ;;  %v3468_v13 = vld [vmem:[%s4249_s17 + $0x420] ss:$16 sps:$4 sm:$0xff]  }
  0xcc   : > { %2028 = vmatprep.subr.bf16.mxu1 %v3418_v38  ;;  %v3473_v12 = vld [vmem:[%s4249_s17 + $0x624] ss:$16 sps:$4 sm:$0xff]   ;;  %v3471_v14 = vld [vmem:[%s4249_s17 + $0x620] ss:$16 sps:$4 sm:$0xff]   ;;  %v4383_v38 = vcombine.high %v4373_v34, %v4373_v34 }
  0xcd   : > { %v3476_v15 = vld [vmem:[%s4249_s17 + $0x444] ss:$16 sps:$4 sm:$0xff]   ;;  %v3474_v17 = vld [vmem:[%s4249_s17 + $0x440] ss:$16 sps:$4 sm:$0xff]  }
  0xce   : > { %1988 = vmatpush1.bf16.msra.mxu0 %v3420_v39  ;;  %v3479_v16 = vld [vmem:[%s4249_s17 + $0x644] ss:$16 sps:$4 sm:$0xff]   ;;  %v3477_v18 = vld [vmem:[%s4249_s17 + $0x640] ss:$16 sps:$4 sm:$0xff]  }
  0xcf   : > { %2029 = vmatpush1.bf16.msra.mxu1 %v3421_v40  ;;  %1989 = vmatprep.subr.bf16.mxu0 %v3422_v41  ;;  %v3482_v19 = vld [vmem:[%s4249_s17 + $0x464] ss:$16 sps:$4 sm:$0xff]   ;;  %v3480_v21 = vld [vmem:[%s4249_s17 + $0x460] ss:$16 sps:$4 sm:$0xff]  }
  0xd0   : > { %2030 = vmatprep.subr.bf16.mxu1 %v3424_v42  ;;  %v3485_v20 = vld [vmem:[%s4249_s17 + $0x664] ss:$16 sps:$4 sm:$0xff]   ;;  %v3483_v22 = vld [vmem:[%s4249_s17 + $0x660] ss:$16 sps:$4 sm:$0xff]  }
  0xd1   : > { %v3488_v23 = vld [vmem:[%s4249_s17 + $0x484] ss:$16 sps:$4 sm:$0xff]   ;;  %v3486_v25 = vld [vmem:[%s4249_s17 + $0x480] ss:$16 sps:$4 sm:$0xff]  }
  0xd2   : > { %1990 = vmatpush1.bf16.msra.mxu0 %v3426_v43  ;;  %v3491_v24 = vld [vmem:[%s4249_s17 + $0x684] ss:$16 sps:$4 sm:$0xff]   ;;  %v3489_v26 = vld [vmem:[%s4249_s17 + $0x680] ss:$16 sps:$4 sm:$0xff]  }
  0xd3   : > { %2031 = vmatpush1.bf16.msra.mxu1 %v3427_v44  ;;  %1991 = vmatprep.subr.bf16.mxu0 %v3428_v45  ;;  %v3494_v27 = vld [vmem:[%s4249_s17 + $0x4a4] ss:$16 sps:$4 sm:$0xff]   ;;  %v3492_v29 = vld [vmem:[%s4249_s17 + $0x4a0] ss:$16 sps:$4 sm:$0xff]  }
  0xd4   : > { %2032 = vmatprep.subr.bf16.mxu1 %v3430_v46  ;;  %v3497_v28 = vld [vmem:[%s4249_s17 + $0x6a4] ss:$16 sps:$4 sm:$0xff]   ;;  %v3495_v30 = vld [vmem:[%s4249_s17 + $0x6a0] ss:$16 sps:$4 sm:$0xff]  }
  0xd5   : > { %v3500_v31 = vld [vmem:[%s4249_s17 + $0x4c4] ss:$16 sps:$4 sm:$0xff]   ;;  %v3498_v35 = vld [vmem:[%s4249_s17 + $0x4c0] ss:$16 sps:$4 sm:$0xff]  }
  0xd6   : > { %1992 = vmatpush1.bf16.msra.mxu0 %v3432_v50  ;;  %v3503_v32 = vld [vmem:[%s4249_s17 + $0x6c4] ss:$16 sps:$4 sm:$0xff]   ;;  %v3501_v36 = vld [vmem:[%s4249_s17 + $0x6c0] ss:$16 sps:$4 sm:$0xff]  }
  0xd7   : > { %2033 = vmatpush1.bf16.msra.mxu1 %v3433_v51  ;;  %1993 = vmatprep.subr.bf16.mxu0 %v3434_v53  ;;  %v4370_v33 = vld [vmem:[%s4242_s23 + $0x10] sm:$0xff] }
  0xd8   : > { %2034 = vmatprep.subr.bf16.mxu1 %v3436_v54  ;;  %v4379_v37 = vcombine.high %v4370_v33, %v4370_v33  ;;  %v3506_v39 = vld [vmem:[%s4249_s17 + $0x4e4] ss:$16 sps:$4 sm:$0xff]   ;;  %v3504_v41 = vld [vmem:[%s4249_s17 + $0x4e0] ss:$16 sps:$4 sm:$0xff]  }
  0xd9   : > { %v3509_v40 = vld [vmem:[%s4249_s17 + $0x6e4] ss:$16 sps:$4 sm:$0xff]   ;;  %v3507_v42 = vld [vmem:[%s4249_s17 + $0x6e0] ss:$16 sps:$4 sm:$0xff]  }
  0xda   : > { %1994 = vmatpush1.bf16.msra.mxu0 %v3438_v55  ;;  %v3512_v43 = vld [vmem:[%s4249_s17 + $0x504] ss:$16 sps:$4 sm:$0xff]   ;;  %v3510_v45 = vld [vmem:[%s4249_s17 + $0x500] ss:$16 sps:$4 sm:$0xff]  }
  0xdb   : > { %2035 = vmatpush1.bf16.msra.mxu1 %v3439_v56  ;;  %1995 = vmatprep.subr.bf16.mxu0 %v3440_v57  ;;  %v3515_v44 = vld [vmem:[%s4249_s17 + $0x704] ss:$16 sps:$4 sm:$0xff]   ;;  %v3513_v46 = vld [vmem:[%s4249_s17 + $0x700] ss:$16 sps:$4 sm:$0xff]  }
  0xdc   : > { %2036 = vmatprep.subr.bf16.mxu1 %v3442_v58  ;;  %v3518_v47 = vld [vmem:[%s4249_s17 + $0x524] ss:$16 sps:$4 sm:$0xff]   ;;  %v3516_v50 = vld [vmem:[%s4249_s17 + $0x520] ss:$16 sps:$4 sm:$0xff]  }
  0xdd   : > { %v3521_v49 = vld [vmem:[%s4249_s17 + $0x724] ss:$16 sps:$4 sm:$0xff]   ;;  %v3519_v51 = vld [vmem:[%s4249_s17 + $0x720] ss:$16 sps:$4 sm:$0xff]  }
  0xde   : > { %1996 = vmatpush1.bf16.msra.mxu0 %v3444_v59  ;;  %v3524_v53 = vld [vmem:[%s4249_s17 + $0x544] ss:$16 sps:$4 sm:$0xff]   ;;  %v3522_v55 = vld [vmem:[%s4249_s17 + $0x540] ss:$16 sps:$4 sm:$0xff]  }
  0xdf   : > { %2037 = vmatpush1.bf16.msra.mxu1 %v3445_v60  ;;  %1997 = vmatprep.subr.bf16.mxu0 %v3446_v61  ;;  %v3527_v54 = vld [vmem:[%s4249_s17 + $0x744] ss:$16 sps:$4 sm:$0xff]   ;;  %v3525_v56 = vld [vmem:[%s4249_s17 + $0x740] ss:$16 sps:$4 sm:$0xff]  }
  0xe0   : > { %2038 = vmatprep.subr.bf16.mxu1 %v3448_v62  ;;  %v3530_v57 = vld [vmem:[%s4249_s17 + $0x564] ss:$16 sps:$4 sm:$0xff]   ;;  %v3528_v59 = vld [vmem:[%s4249_s17 + $0x560] ss:$16 sps:$4 sm:$0xff]  }
  0xe1   : > { %v3533_v58 = vld [vmem:[%s4249_s17 + $0x764] ss:$16 sps:$4 sm:$0xff]   ;;  %v3531_v60 = vld [vmem:[%s4249_s17 + $0x760] ss:$16 sps:$4 sm:$0xff]  }
  0xe2   : > { %1998 = vmatpush1.bf16.msra.mxu0 %v3450_v63  ;;  %v3536_v61 = vld [vmem:[%s4249_s17 + $0x584] ss:$16 sps:$4 sm:$0xff]   ;;  %v3534_v63 = vld [vmem:[%s4249_s17 + $0x580] ss:$16 sps:$4 sm:$0xff]  }
  0xe3   : > { %2039 = vmatpush1.bf16.msra.mxu1 %v3451_v0  ;;  %1999 = vmatprep.subr.bf16.mxu0 %v3452_v1  ;;  %v3539_v62 = vld [vmem:[%s4249_s17 + $0x784] ss:$16 sps:$4 sm:$0xff]   ;;  %v3537_v0 = vld [vmem:[%s4249_s17 + $0x780] ss:$16 sps:$4 sm:$0xff]  }
  0xe4   : > { %2040 = vmatprep.subr.bf16.mxu1 %v3454_v2  ;;  %v3542_v1 = vld [vmem:[%s4249_s17 + $0x5a4] ss:$16 sps:$4 sm:$0xff]  }
  0xe5   : > { %v3545_v2 = vld [vmem:[%s4249_s17 + $0x7a4] ss:$16 sps:$4 sm:$0xff]  }
  0xe6   : > { %2000 = vmatpush1.bf16.msra.mxu0 %v3456_v3  ;;  %v3540_v3 = vld [vmem:[%s4249_s17 + $0x5a0] ss:$16 sps:$4 sm:$0xff]  }
  0xe7   : > { %2041 = vmatpush1.bf16.msra.mxu1 %v3457_v4  ;;  %2051 = vmatprep.subr.bf16.mxu0 %v3464_v5  ;;  %v3543_v4 = vld [vmem:[%s4249_s17 + $0x7a0] ss:$16 sps:$4 sm:$0xff]   ;;  %v3548_v5 = vld [vmem:[%s4249_s17 + $0x5c4] ss:$16 sps:$4 sm:$0xff]  }
  0xe8   : > { %2092 = vmatprep.subr.bf16.mxu1 %v3467_v6  ;;  %v3551_v6 = vld [vmem:[%s4249_s17 + $0x7c4] ss:$16 sps:$4 sm:$0xff]  }
  0xe9   : > { %2002 = vmatmul.mubr.bf16.vlgmr.msra.gmra.mrb[0].mxu0 %v4339_v7 }
  0xea   : > { %2043 = vmatmul.mubr.bf16.vlgmr.msra.gmra.mrb[0].mxu1 %v4341_v8  ;;  %2052 = vmatpush1.bf16.msra.mxu0 %v3462_v9  ;;  %v3546_v9 = vld [vmem:[%s4249_s17 + $0x5c0] ss:$16 sps:$4 sm:$0xff]  }
  0xeb   : > { %2093 = vmatpush1.bf16.msra.mxu1 %v3465_v10  ;;  %2053 = vmatprep.subr.bf16.mxu0 %v3470_v11  ;;  %v3549_v10 = vld [vmem:[%s4249_s17 + $0x7c0] ss:$16 sps:$4 sm:$0xff]   ;;  %v3554_v11 = vld [vmem:[%s4249_s17 + $0x5e4] ss:$16 sps:$4 sm:$0xff]  }
  0xec   : > { %2094 = vmatprep.subr.bf16.mxu1 %v3473_v12  ;;  %2083 = vmatprep.mubr.bf16.mxu0 %v4379_v37  ;;  %v3557_v12 = vld [vmem:[%s4249_s17 + $0x7e4] ss:$16 sps:$4 sm:$0xff]  }
  0xed   : > { %2124 = vmatprep.mubr.bf16.mxu1 %v4383_v38 }
  0xee   : > { %2054 = vmatpush1.bf16.msra.mxu0 %v3468_v13  ;;  %v3552_v13 = vld [vmem:[%s4249_s17 + $0x5e0] ss:$16 sps:$4 sm:$0xff]  }
  0xef   : > { %2095 = vmatpush1.bf16.msra.mxu1 %v3471_v14  ;;  %2055 = vmatprep.subr.bf16.mxu0 %v3476_v15  ;;  %v3555_v14 = vld [vmem:[%s4249_s17 + $0x7e0] ss:$16 sps:$4 sm:$0xff]   ;;  %v3564_v15 = vld [vmem:[%s4249_s17 + $0xc] ss:$16 sps:$4 sm:$0xff]  }
  0xf0   : > { %2096 = vmatprep.subr.bf16.mxu1 %v3479_v16  ;;  %v3567_v16 = vld [vmem:[%s4249_s17 + $0x20c] ss:$16 sps:$4 sm:$0xff]  }
  0xf2   : > { %2056 = vmatpush1.bf16.msra.mxu0 %v3474_v17  ;;  %v4427_v17 = vcombine.low %v4370_v33, %v4370_v33  ;;  %v3586_v33 = vld [vmem:[%s4249_s17 + $0x88] ss:$16 sps:$4 sm:$0xff]  }
  0xf3   : > { %2097 = vmatpush1.bf16.msra.mxu1 %v3477_v18  ;;  %2057 = vmatprep.subr.bf16.mxu0 %v3482_v19  ;;  %v4431_v18 = vcombine.low %v4373_v34, %v4373_v34  ;;  %v3562_v19 = vld [vmem:[%s4249_s17 + $0x8] ss:$16 sps:$4 sm:$0xff]  }
  0xf4   : > { %2098 = vmatprep.subr.bf16.mxu1 %v3485_v20  ;;  %v3565_v20 = vld [vmem:[%s4249_s17 + $0x208] ss:$16 sps:$4 sm:$0xff]  }
  0xf5   : > { %v3589_v34 = vld [vmem:[%s4249_s17 + $0x288] ss:$16 sps:$4 sm:$0xff]  }
  0xf6   : > { %2058 = vmatpush1.bf16.msra.mxu0 %v3480_v21  ;;  %v3570_v21 = vld [vmem:[%s4249_s17 + $0x2c] ss:$16 sps:$4 sm:$0xff]  }
  0xf7   : > { %2099 = vmatpush1.bf16.msra.mxu1 %v3483_v22  ;;  %2059 = vmatprep.subr.bf16.mxu0 %v3488_v23  ;;  %v3573_v22 = vld [vmem:[%s4249_s17 + $0x22c] ss:$16 sps:$4 sm:$0xff]   ;;  %v3568_v23 = vld [vmem:[%s4249_s17 + $0x28] ss:$16 sps:$4 sm:$0xff]  }
  0xf8   : > { %2100 = vmatprep.subr.bf16.mxu1 %v3491_v24  ;;  %v3571_v24 = vld [vmem:[%s4249_s17 + $0x228] ss:$16 sps:$4 sm:$0xff]  }
  0xfa   : > { %2060 = vmatpush1.bf16.msra.mxu0 %v3486_v25  ;;  %v3576_v25 = vld [vmem:[%s4249_s17 + $0x4c] ss:$16 sps:$4 sm:$0xff]  }
  0xfb   : > { %2101 = vmatpush1.bf16.msra.mxu1 %v3489_v26  ;;  %2061 = vmatprep.subr.bf16.mxu0 %v3494_v27  ;;  %v3579_v26 = vld [vmem:[%s4249_s17 + $0x24c] ss:$16 sps:$4 sm:$0xff]   ;;  %v3574_v27 = vld [vmem:[%s4249_s17 + $0x48] ss:$16 sps:$4 sm:$0xff]  }
  0xfc   : > { %2102 = vmatprep.subr.bf16.mxu1 %v3497_v28  ;;  %v3577_v28 = vld [vmem:[%s4249_s17 + $0x248] ss:$16 sps:$4 sm:$0xff]  }
  0xfe   : > { %2062 = vmatpush1.bf16.msra.mxu0 %v3492_v29  ;;  %v3582_v29 = vld [vmem:[%s4249_s17 + $0x6c] ss:$16 sps:$4 sm:$0xff]  }
  0xff   : > { %2103 = vmatpush1.bf16.msra.mxu1 %v3495_v30  ;;  %2063 = vmatprep.subr.bf16.mxu0 %v3500_v31  ;;  %v3585_v30 = vld [vmem:[%s4249_s17 + $0x26c] ss:$16 sps:$4 sm:$0xff]   ;;  %v3580_v31 = vld [vmem:[%s4249_s17 + $0x68] ss:$16 sps:$4 sm:$0xff]  }
 0x100   : > { %2104 = vmatprep.subr.bf16.mxu1 %v3503_v32  ;;  %v3583_v32 = vld [vmem:[%s4249_s17 + $0x268] ss:$16 sps:$4 sm:$0xff]  }
 0x102   : > { %2064 = vmatpush1.bf16.msra.mxu0 %v3498_v35  ;;  %v3594_v35 = vld [vmem:[%s4249_s17 + $0xac] ss:$16 sps:$4 sm:$0xff]  }
 0x103   : > { %2105 = vmatpush1.bf16.msra.mxu1 %v3501_v36  ;;  %2065 = vmatprep.subr.bf16.mxu0 %v3506_v39  ;;  %v3597_v36 = vld [vmem:[%s4249_s17 + $0x2ac] ss:$16 sps:$4 sm:$0xff]   ;;  %v3592_v39 = vld [vmem:[%s4249_s17 + $0xa8] ss:$16 sps:$4 sm:$0xff]  }
 0x104   : > { %2106 = vmatprep.subr.bf16.mxu1 %v3509_v40  ;;  %v3595_v40 = vld [vmem:[%s4249_s17 + $0x2a8] ss:$16 sps:$4 sm:$0xff]  }
 0x106   : > { %2066 = vmatpush1.bf16.msra.mxu0 %v3504_v41  ;;  %v3600_v41 = vld [vmem:[%s4249_s17 + $0xcc] ss:$16 sps:$4 sm:$0xff]  }
 0x107   : > { %2107 = vmatpush1.bf16.msra.mxu1 %v3507_v42  ;;  %2067 = vmatprep.subr.bf16.mxu0 %v3512_v43  ;;  %v3603_v42 = vld [vmem:[%s4249_s17 + $0x2cc] ss:$16 sps:$4 sm:$0xff]   ;;  %v3598_v43 = vld [vmem:[%s4249_s17 + $0xc8] ss:$16 sps:$4 sm:$0xff]  }
 0x108   : > { %2108 = vmatprep.subr.bf16.mxu1 %v3515_v44  ;;  %v3601_v44 = vld [vmem:[%s4249_s17 + $0x2c8] ss:$16 sps:$4 sm:$0xff]  }
 0x10a   : > { %2068 = vmatpush1.bf16.msra.mxu0 %v3510_v45  ;;  %v3606_v45 = vld [vmem:[%s4249_s17 + $0xec] ss:$16 sps:$4 sm:$0xff]  }
 0x10b   : > { %2109 = vmatpush1.bf16.msra.mxu1 %v3513_v46  ;;  %2069 = vmatprep.subr.bf16.mxu0 %v3518_v47  ;;  %v3609_v46 = vld [vmem:[%s4249_s17 + $0x2ec] ss:$16 sps:$4 sm:$0xff]   ;;  %v3604_v47 = vld [vmem:[%s4249_s17 + $0xe8] ss:$16 sps:$4 sm:$0xff]  }
 0x10c   : > { %2110 = vmatprep.subr.bf16.mxu1 %v3521_v49  ;;  %v3607_v49 = vld [vmem:[%s4249_s17 + $0x2e8] ss:$16 sps:$4 sm:$0xff]  }
 0x10e   : > { %2070 = vmatpush1.bf16.msra.mxu0 %v3516_v50  ;;  %v3612_v50 = vld [vmem:[%s4249_s17 + $0x10c] ss:$16 sps:$4 sm:$0xff]  }
 0x10f   : > { %2111 = vmatpush1.bf16.msra.mxu1 %v3519_v51  ;;  %2071 = vmatprep.subr.bf16.mxu0 %v3524_v53  ;;  %v3615_v51 = vld [vmem:[%s4249_s17 + $0x30c] ss:$16 sps:$4 sm:$0xff]   ;;  %v3610_v53 = vld [vmem:[%s4249_s17 + $0x108] ss:$16 sps:$4 sm:$0xff]  }
 0x110   : > { %2112 = vmatprep.subr.bf16.mxu1 %v3527_v54  ;;  %v3613_v54 = vld [vmem:[%s4249_s17 + $0x308] ss:$16 sps:$4 sm:$0xff]  }
 0x112   : > { %2072 = vmatpush1.bf16.msra.mxu0 %v3522_v55  ;;  %v3618_v55 = vld [vmem:[%s4249_s17 + $0x12c] ss:$16 sps:$4 sm:$0xff]  }
 0x113   : > { %2113 = vmatpush1.bf16.msra.mxu1 %v3525_v56  ;;  %2073 = vmatprep.subr.bf16.mxu0 %v3530_v57  ;;  %v3621_v56 = vld [vmem:[%s4249_s17 + $0x32c] ss:$16 sps:$4 sm:$0xff]   ;;  %v3616_v57 = vld [vmem:[%s4249_s17 + $0x128] ss:$16 sps:$4 sm:$0xff]  }
 0x114   : > { %2114 = vmatprep.subr.bf16.mxu1 %v3533_v58  ;;  %v3619_v58 = vld [vmem:[%s4249_s17 + $0x328] ss:$16 sps:$4 sm:$0xff]  }
 0x116   : > { %2074 = vmatpush1.bf16.msra.mxu0 %v3528_v59  ;;  %v3624_v59 = vld [vmem:[%s4249_s17 + $0x14c] ss:$16 sps:$4 sm:$0xff]  }
 0x117   : > { %2115 = vmatpush1.bf16.msra.mxu1 %v3531_v60  ;;  %2075 = vmatprep.subr.bf16.mxu0 %v3536_v61  ;;  %v3627_v60 = vld [vmem:[%s4249_s17 + $0x34c] ss:$16 sps:$4 sm:$0xff]   ;;  %v3622_v61 = vld [vmem:[%s4249_s17 + $0x148] ss:$16 sps:$4 sm:$0xff]  }
 0x118   : > { %2116 = vmatprep.subr.bf16.mxu1 %v3539_v62  ;;  %v3625_v62 = vld [vmem:[%s4249_s17 + $0x348] ss:$16 sps:$4 sm:$0xff]  }
 0x11a   : > { %2076 = vmatpush1.bf16.msra.mxu0 %v3534_v63  ;;  %v3630_v63 = vld [vmem:[%s4249_s17 + $0x16c] ss:$16 sps:$4 sm:$0xff]  }
 0x11b   : > { %2117 = vmatpush1.bf16.msra.mxu1 %v3537_v0  ;;  %2077 = vmatprep.subr.bf16.mxu0 %v3542_v1  ;;  %v3633_v0 = vld [vmem:[%s4249_s17 + $0x36c] ss:$16 sps:$4 sm:$0xff]   ;;  %v3628_v1 = vld [vmem:[%s4249_s17 + $0x168] ss:$16 sps:$4 sm:$0xff]  }
 0x11c   : > { %2118 = vmatprep.subr.bf16.mxu1 %v3545_v2  ;;  %v3631_v2 = vld [vmem:[%s4249_s17 + $0x368] ss:$16 sps:$4 sm:$0xff]  }
 0x11e   : > { %2078 = vmatpush1.bf16.msra.mxu0 %v3540_v3  ;;  %v3636_v3 = vld [vmem:[%s4249_s17 + $0x18c] ss:$16 sps:$4 sm:$0xff]  }
 0x11f   : > { %2119 = vmatpush1.bf16.msra.mxu1 %v3543_v4  ;;  %2079 = vmatprep.subr.bf16.mxu0 %v3548_v5  ;;  %v3639_v4 = vld [vmem:[%s4249_s17 + $0x38c] ss:$16 sps:$4 sm:$0xff]   ;;  %v3634_v5 = vld [vmem:[%s4249_s17 + $0x188] ss:$16 sps:$4 sm:$0xff]  }
 0x120   : > { %2120 = vmatprep.subr.bf16.mxu1 %v3551_v6  ;;  %v3637_v6 = vld [vmem:[%s4249_s17 + $0x388] ss:$16 sps:$4 sm:$0xff]  }
 0x122   : > { %2080 = vmatpush1.bf16.msra.mxu0 %v3546_v9  ;;  %v3642_v9 = vld [vmem:[%s4249_s17 + $0x1ac] ss:$16 sps:$4 sm:$0xff]  }
 0x123   : > { %2121 = vmatpush1.bf16.msra.mxu1 %v3549_v10  ;;  %2081 = vmatprep.subr.bf16.mxu0 %v3554_v11  ;;  %v3645_v10 = vld [vmem:[%s4249_s17 + $0x3ac] ss:$16 sps:$4 sm:$0xff]   ;;  %v3640_v11 = vld [vmem:[%s4249_s17 + $0x1a8] ss:$16 sps:$4 sm:$0xff]  }
 0x124   : > { %2122 = vmatprep.subr.bf16.mxu1 %v3557_v12  ;;  %v3643_v12 = vld [vmem:[%s4249_s17 + $0x3a8] ss:$16 sps:$4 sm:$0xff]  }
 0x126   : > { %2082 = vmatpush1.bf16.msra.mxu0 %v3552_v13  ;;  %v3648_v13 = vld [vmem:[%s4249_s17 + $0x1cc] ss:$16 sps:$4 sm:$0xff]  }
 0x127   : > { %2123 = vmatpush1.bf16.msra.mxu1 %v3555_v14  ;;  %2133 = vmatprep.subr.bf16.mxu0 %v3564_v15  ;;  %v3651_v14 = vld [vmem:[%s4249_s17 + $0x3cc] ss:$16 sps:$4 sm:$0xff]   ;;  %v3646_v15 = vld [vmem:[%s4249_s17 + $0x1c8] ss:$16 sps:$4 sm:$0xff]  }
 0x128   : > { %2174 = vmatprep.subr.bf16.mxu1 %v3567_v16  ;;  %v3649_v16 = vld [vmem:[%s4249_s17 + $0x3c8] ss:$16 sps:$4 sm:$0xff]  }
 0x129   : > { %2084 = vmatmul.mubr.bf16.vlgmr.msra.gmra.mrb[4].mxu0 %v4427_v17 }
 0x12a   : > { %2125 = vmatmul.mubr.bf16.vlgmr.msra.gmra.mrb[4].mxu1 %v4431_v18  ;;  %2134 = vmatpush1.bf16.msra.mxu0 %v3562_v19  ;;  %v3654_v19 = vld [vmem:[%s4249_s17 + $0x1ec] ss:$16 sps:$4 sm:$0xff]  }
 0x12b   : > { %2175 = vmatpush1.bf16.msra.mxu1 %v3565_v20  ;;  %2135 = vmatprep.subr.bf16.mxu0 %v3570_v21  ;;  %v3657_v20 = vld [vmem:[%s4249_s17 + $0x3ec] ss:$16 sps:$4 sm:$0xff]   ;;  %v3652_v21 = vld [vmem:[%s4249_s17 + $0x1e8] ss:$16 sps:$4 sm:$0xff]  }
 0x12c   : > { %2176 = vmatprep.subr.bf16.mxu1 %v3573_v22  ;;  %2165 = vmatprep.mubr.bf16.mxu0 %v4312_v48  ;;  %v3588_v48 = vld [vmem:[%s4249_s17 + $0x8c] ss:$16 sps:$4 sm:$0xff]   ;;  %v3655_v22 = vld [vmem:[%s4249_s17 + $0x3e8] ss:$16 sps:$4 sm:$0xff]  }
 0x12d   : > { %2206 = vmatprep.mubr.bf16.mxu1 %v4317_v52  ;;  %v3591_v52 = vld [vmem:[%s4249_s17 + $0x28c] ss:$16 sps:$4 sm:$0xff]  }
 0x12e   : > { %2136 = vmatpush1.bf16.msra.mxu0 %v3568_v23  ;;  %v3660_v23 = vld [vmem:[%s4249_s17 + $0x40c] ss:$16 sps:$4 sm:$0xff]  }
 0x12f   : > { %2177 = vmatpush1.bf16.msra.mxu1 %v3571_v24  ;;  %2137 = vmatprep.subr.bf16.mxu0 %v3576_v25  ;;  %v3663_v24 = vld [vmem:[%s4249_s17 + $0x60c] ss:$16 sps:$4 sm:$0xff]   ;;  %v3658_v25 = vld [vmem:[%s4249_s17 + $0x408] ss:$16 sps:$4 sm:$0xff]  }
 0x130   : > { %2178 = vmatprep.subr.bf16.mxu1 %v3579_v26  ;;  %v3661_v26 = vld [vmem:[%s4249_s17 + $0x608] ss:$16 sps:$4 sm:$0xff]  }
 0x132   : > { %2138 = vmatpush1.bf16.msra.mxu0 %v3574_v27  ;;  %v3666_v27 = vld [vmem:[%s4249_s17 + $0x42c] ss:$16 sps:$4 sm:$0xff]  }
 0x133   : > { %2179 = vmatpush1.bf16.msra.mxu1 %v3577_v28  ;;  %2139 = vmatprep.subr.bf16.mxu0 %v3582_v29  ;;  %v3669_v28 = vld [vmem:[%s4249_s17 + $0x62c] ss:$16 sps:$4 sm:$0xff]   ;;  %v3664_v29 = vld [vmem:[%s4249_s17 + $0x428] ss:$16 sps:$4 sm:$0xff]  }
 0x134   : > { %2180 = vmatprep.subr.bf16.mxu1 %v3585_v30  ;;  %v3667_v30 = vld [vmem:[%s4249_s17 + $0x628] ss:$16 sps:$4 sm:$0xff]  }
 0x136   : > { %2140 = vmatpush1.bf16.msra.mxu0 %v3580_v31  ;;  %v3672_v31 = vld [vmem:[%s4249_s17 + $0x44c] ss:$16 sps:$4 sm:$0xff]  }
 0x137   : > { %2181 = vmatpush1.bf16.msra.mxu1 %v3583_v32  ;;  %2141 = vmatprep.subr.bf16.mxu0 %v3588_v48  ;;  %v3675_v32 = vld [vmem:[%s4249_s17 + $0x64c] ss:$16 sps:$4 sm:$0xff]  }
 0x138   : > { %2182 = vmatprep.subr.bf16.mxu1 %v3591_v52  ;;  %v3678_v48 = vld [vmem:[%s4249_s17 + $0x46c] ss:$16 sps:$4 sm:$0xff]  }
 0x139   : > { %v3681_v52 = vld [vmem:[%s4249_s17 + $0x66c] ss:$16 sps:$4 sm:$0xff]  }
 0x13a   : > { %2142 = vmatpush1.bf16.msra.mxu0 %v3586_v33  ;;  %v3676_v33 = vld [vmem:[%s4249_s17 + $0x468] ss:$16 sps:$4 sm:$0xff]  }
 0x13b   : > { %2183 = vmatpush1.bf16.msra.mxu1 %v3589_v34  ;;  %2143 = vmatprep.subr.bf16.mxu0 %v3594_v35  ;;  %v3687_v34 = vld [vmem:[%s4249_s17 + $0x68c] ss:$16 sps:$4 sm:$0xff]   ;;  %v3682_v35 = vld [vmem:[%s4249_s17 + $0x488] ss:$16 sps:$4 sm:$0xff]  }
 0x13c   : > { %2184 = vmatprep.subr.bf16.mxu1 %v3597_v36  ;;  %v3685_v36 = vld [vmem:[%s4249_s17 + $0x688] ss:$16 sps:$4 sm:$0xff]  }
 0x13e   : > { %2144 = vmatpush1.bf16.msra.mxu0 %v3592_v39  ;;  %v3690_v39 = vld [vmem:[%s4249_s17 + $0x4ac] ss:$16 sps:$4 sm:$0xff]  }
 0x13f   : > { %2185 = vmatpush1.bf16.msra.mxu1 %v3595_v40  ;;  %2145 = vmatprep.subr.bf16.mxu0 %v3600_v41  ;;  %v3693_v40 = vld [vmem:[%s4249_s17 + $0x6ac] ss:$16 sps:$4 sm:$0xff]   ;;  %v3688_v41 = vld [vmem:[%s4249_s17 + $0x4a8] ss:$16 sps:$4 sm:$0xff]  }
 0x140   : > { %2186 = vmatprep.subr.bf16.mxu1 %v3603_v42  ;;  %v3691_v42 = vld [vmem:[%s4249_s17 + $0x6a8] ss:$16 sps:$4 sm:$0xff]  }
 0x142   : > { %2146 = vmatpush1.bf16.msra.mxu0 %v3598_v43  ;;  %v3696_v43 = vld [vmem:[%s4249_s17 + $0x4cc] ss:$16 sps:$4 sm:$0xff]  }
 0x143   : > { %2187 = vmatpush1.bf16.msra.mxu1 %v3601_v44  ;;  %2147 = vmatprep.subr.bf16.mxu0 %v3606_v45  ;;  %v3699_v44 = vld [vmem:[%s4249_s17 + $0x6cc] ss:$16 sps:$4 sm:$0xff]   ;;  %v3694_v45 = vld [vmem:[%s4249_s17 + $0x4c8] ss:$16 sps:$4 sm:$0xff]  }
 0x144   : > { %2188 = vmatprep.subr.bf16.mxu1 %v3609_v46  ;;  %v3697_v46 = vld [vmem:[%s4249_s17 + $0x6c8] ss:$16 sps:$4 sm:$0xff]  }
 0x146   : > { %2148 = vmatpush1.bf16.msra.mxu0 %v3604_v47  ;;  %v3702_v47 = vld [vmem:[%s4249_s17 + $0x4ec] ss:$16 sps:$4 sm:$0xff]  }
 0x147   : > { %2189 = vmatpush1.bf16.msra.mxu1 %v3607_v49  ;;  %2149 = vmatprep.subr.bf16.mxu0 %v3612_v50  ;;  %v3705_v49 = vld [vmem:[%s4249_s17 + $0x6ec] ss:$16 sps:$4 sm:$0xff]   ;;  %v3700_v50 = vld [vmem:[%s4249_s17 + $0x4e8] ss:$16 sps:$4 sm:$0xff]  }
 0x148   : > { %2190 = vmatprep.subr.bf16.mxu1 %v3615_v51  ;;  %v3703_v51 = vld [vmem:[%s4249_s17 + $0x6e8] ss:$16 sps:$4 sm:$0xff]  }
 0x14a   : > { %2150 = vmatpush1.bf16.msra.mxu0 %v3610_v53  ;;  %v3708_v53 = vld [vmem:[%s4249_s17 + $0x50c] ss:$16 sps:$4 sm:$0xff]  }
 0x14b   : > { %2191 = vmatpush1.bf16.msra.mxu1 %v3613_v54  ;;  %2151 = vmatprep.subr.bf16.mxu0 %v3618_v55  ;;  %v3711_v54 = vld [vmem:[%s4249_s17 + $0x70c] ss:$16 sps:$4 sm:$0xff]   ;;  %v3706_v55 = vld [vmem:[%s4249_s17 + $0x508] ss:$16 sps:$4 sm:$0xff]  }
 0x14c   : > { %2192 = vmatprep.subr.bf16.mxu1 %v3621_v56  ;;  %v3709_v56 = vld [vmem:[%s4249_s17 + $0x708] ss:$16 sps:$4 sm:$0xff]  }
 0x14e   : > { %2152 = vmatpush1.bf16.msra.mxu0 %v3616_v57  ;;  %v3714_v57 = vld [vmem:[%s4249_s17 + $0x52c] ss:$16 sps:$4 sm:$0xff]  }
 0x14f   : > { %2193 = vmatpush1.bf16.msra.mxu1 %v3619_v58  ;;  %2153 = vmatprep.subr.bf16.mxu0 %v3624_v59  ;;  %v3717_v58 = vld [vmem:[%s4249_s17 + $0x72c] ss:$16 sps:$4 sm:$0xff]   ;;  %v3712_v59 = vld [vmem:[%s4249_s17 + $0x528] ss:$16 sps:$4 sm:$0xff]  }
 0x150   : > { %2194 = vmatprep.subr.bf16.mxu1 %v3627_v60  ;;  %v3715_v60 = vld [vmem:[%s4249_s17 + $0x728] ss:$16 sps:$4 sm:$0xff]  }
 0x152   : > { %2154 = vmatpush1.bf16.msra.mxu0 %v3622_v61  ;;  %v3720_v61 = vld [vmem:[%s4249_s17 + $0x54c] ss:$16 sps:$4 sm:$0xff]  }
 0x153   : > { %2195 = vmatpush1.bf16.msra.mxu1 %v3625_v62  ;;  %2155 = vmatprep.subr.bf16.mxu0 %v3630_v63  ;;  %v3723_v62 = vld [vmem:[%s4249_s17 + $0x74c] ss:$16 sps:$4 sm:$0xff]   ;;  %v3718_v63 = vld [vmem:[%s4249_s17 + $0x548] ss:$16 sps:$4 sm:$0xff]  }
 0x154   : > { %2196 = vmatprep.subr.bf16.mxu1 %v3633_v0  ;;  %v3721_v0 = vld [vmem:[%s4249_s17 + $0x748] ss:$16 sps:$4 sm:$0xff]  }
 0x156   : > { %2156 = vmatpush1.bf16.msra.mxu0 %v3628_v1  ;;  %v3726_v1 = vld [vmem:[%s4249_s17 + $0x56c] ss:$16 sps:$4 sm:$0xff]  }
 0x157   : > { %2197 = vmatpush1.bf16.msra.mxu1 %v3631_v2  ;;  %2157 = vmatprep.subr.bf16.mxu0 %v3636_v3  ;;  %v3729_v2 = vld [vmem:[%s4249_s17 + $0x76c] ss:$16 sps:$4 sm:$0xff]   ;;  %v3724_v3 = vld [vmem:[%s4249_s17 + $0x568] ss:$16 sps:$4 sm:$0xff]  }
 0x158   : > { %2198 = vmatprep.subr.bf16.mxu1 %v3639_v4  ;;  %v3727_v4 = vld [vmem:[%s4249_s17 + $0x768] ss:$16 sps:$4 sm:$0xff]  }
 0x15a   : > { %2158 = vmatpush1.bf16.msra.mxu0 %v3634_v5  ;;  %v3732_v5 = vld [vmem:[%s4249_s17 + $0x58c] ss:$16 sps:$4 sm:$0xff]  }
 0x15b   : > { %2199 = vmatpush1.bf16.msra.mxu1 %v3637_v6  ;;  %2159 = vmatprep.subr.bf16.mxu0 %v3642_v9  ;;  %v3735_v6 = vld [vmem:[%s4249_s17 + $0x78c] ss:$16 sps:$4 sm:$0xff]   ;;  %v3730_v9 = vld [vmem:[%s4249_s17 + $0x588] ss:$16 sps:$4 sm:$0xff]  }
 0x15c   : > { %2200 = vmatprep.subr.bf16.mxu1 %v3645_v10  ;;  %v3733_v10 = vld [vmem:[%s4249_s17 + $0x788] ss:$16 sps:$4 sm:$0xff]  }
 0x15e   : > { %2160 = vmatpush1.bf16.msra.mxu0 %v3640_v11  ;;  %v3738_v11 = vld [vmem:[%s4249_s17 + $0x5ac] ss:$16 sps:$4 sm:$0xff]  }
 0x15f   : > { %2201 = vmatpush1.bf16.msra.mxu1 %v3643_v12  ;;  %2161 = vmatprep.subr.bf16.mxu0 %v3648_v13  ;;  %v3741_v12 = vld [vmem:[%s4249_s17 + $0x7ac] ss:$16 sps:$4 sm:$0xff]   ;;  %v3736_v13 = vld [vmem:[%s4249_s17 + $0x5a8] ss:$16 sps:$4 sm:$0xff]  }
 0x160   : > { %2202 = vmatprep.subr.bf16.mxu1 %v3651_v14  ;;  %v3739_v14 = vld [vmem:[%s4249_s17 + $0x7a8] ss:$16 sps:$4 sm:$0xff]  }
 0x162   : > { %2162 = vmatpush1.bf16.msra.mxu0 %v3646_v15  ;;  %v3744_v15 = vld [vmem:[%s4249_s17 + $0x5cc] ss:$16 sps:$4 sm:$0xff]  }
 0x163   : > { %2203 = vmatpush1.bf16.msra.mxu1 %v3649_v16  ;;  %2163 = vmatprep.subr.bf16.mxu0 %v3654_v19  ;;  %v3747_v16 = vld [vmem:[%s4249_s17 + $0x7cc] ss:$16 sps:$4 sm:$0xff]   ;;  %v3742_v19 = vld [vmem:[%s4249_s17 + $0x5c8] ss:$16 sps:$4 sm:$0xff]  }
 0x164   : > { %2204 = vmatprep.subr.bf16.mxu1 %v3657_v20  ;;  %v3745_v20 = vld [vmem:[%s4249_s17 + $0x7c8] ss:$16 sps:$4 sm:$0xff]  }
 0x166   : > { %2164 = vmatpush1.bf16.msra.mxu0 %v3652_v21  ;;  %v3750_v21 = vld [vmem:[%s4249_s17 + $0x5ec] ss:$16 sps:$4 sm:$0xff]  }
 0x167   : > { %2205 = vmatpush1.bf16.msra.mxu1 %v3655_v22  ;;  %2215 = vmatprep.subr.bf16.mxu0 %v3660_v23  ;;  %v3753_v22 = vld [vmem:[%s4249_s17 + $0x7ec] ss:$16 sps:$4 sm:$0xff]   ;;  %v3748_v23 = vld [vmem:[%s4249_s17 + $0x5e8] ss:$16 sps:$4 sm:$0xff]  }
 0x168   : > { %2256 = vmatprep.subr.bf16.mxu1 %v3663_v24  ;;  %v3751_v24 = vld [vmem:[%s4249_s17 + $0x7e8] ss:$16 sps:$4 sm:$0xff]  }
 0x169   : > { %2166 = vmatmul.mubr.bf16.vlgmr.msra.gmra.mrb[8].mxu0 %v4339_v7  ;;  %v3670_v7 = vld [vmem:[%s4249_s17 + $0x448] ss:$16 sps:$4 sm:$0xff]  }
 0x16a   : > { %2207 = vmatmul.mubr.bf16.vlgmr.msra.gmra.mrb[8].mxu1 %v4341_v8  ;;  %2216 = vmatpush1.bf16.msra.mxu0 %v3658_v25  ;;  %v3673_v8 = vld [vmem:[%s4249_s17 + $0x648] ss:$16 sps:$4 sm:$0xff]  }
 0x16b   : > { %2257 = vmatpush1.bf16.msra.mxu1 %v3661_v26  ;;  %2217 = vmatprep.subr.bf16.mxu0 %v3666_v27 }
 0x16c   : > { %2258 = vmatprep.subr.bf16.mxu1 %v3669_v28  ;;  %2247 = vmatprep.mubr.bf16.mxu0 %v4379_v37  ;;  %v3679_v37 = vld [vmem:[%s4249_s17 + $0x668] ss:$16 sps:$4 sm:$0xff]  }
 0x16d   : > { %2288 = vmatprep.mubr.bf16.mxu1 %v4383_v38  ;;  %v3684_v38 = vld [vmem:[%s4249_s17 + $0x48c] ss:$16 sps:$4 sm:$0xff]  }
 0x16e   : > { %2218 = vmatpush1.bf16.msra.mxu0 %v3664_v29 }
 0x16f   : > { %2259 = vmatpush1.bf16.msra.mxu1 %v3667_v30  ;;  %2219 = vmatprep.subr.bf16.mxu0 %v3672_v31 }
 0x170   : > { %2260 = vmatprep.subr.bf16.mxu1 %v3675_v32 }
 0x172   : > { %2220 = vmatpush1.bf16.msra.mxu0 %v3670_v7 }
 0x173   : > { %2261 = vmatpush1.bf16.msra.mxu1 %v3673_v8  ;;  %2221 = vmatprep.subr.bf16.mxu0 %v3678_v48 }
 0x174   : > { %2262 = vmatprep.subr.bf16.mxu1 %v3681_v52 }
 0x176   : > { %2222 = vmatpush1.bf16.msra.mxu0 %v3676_v33 }
 0x177   : > { %2263 = vmatpush1.bf16.msra.mxu1 %v3679_v37  ;;  %2223 = vmatprep.subr.bf16.mxu0 %v3684_v38 }
 0x178   : > { %2264 = vmatprep.subr.bf16.mxu1 %v3687_v34  ;;  %v397_v34 = vld [vmem:[#allocation2] sm:$0xff] }
 0x17a   : > { %2224 = vmatpush1.bf16.msra.mxu0 %v3682_v35 }
 0x17b   : > { %2265 = vmatpush1.bf16.msra.mxu1 %v3685_v36  ;;  %2225 = vmatprep.subr.bf16.mxu0 %v3690_v39  ;;  %v398_v39 = vld [vmem:[#allocation2 + $0x8] sm:$0xff] }
 0x17c   : > { %2266 = vmatprep.subr.bf16.mxu1 %v3693_v40 }
 0x17e   : > { %2226 = vmatpush1.bf16.msra.mxu0 %v3688_v41 }
 0x17f   : > { %2267 = vmatpush1.bf16.msra.mxu1 %v3691_v42  ;;  %2227 = vmatprep.subr.bf16.mxu0 %v3696_v43 }
 0x180   : > { %2268 = vmatprep.subr.bf16.mxu1 %v3699_v44 }
 0x182   : > { %2228 = vmatpush1.bf16.msra.mxu0 %v3694_v45 }
 0x183   : > { %2269 = vmatpush1.bf16.msra.mxu1 %v3697_v46  ;;  %2229 = vmatprep.subr.bf16.mxu0 %v3702_v47 }
 0x184   : > { %2270 = vmatprep.subr.bf16.mxu1 %v3705_v49 }
 0x186   : > { %2230 = vmatpush1.bf16.msra.mxu0 %v3700_v50 }
 0x187   : > { %2271 = vmatpush1.bf16.msra.mxu1 %v3703_v51  ;;  %2231 = vmatprep.subr.bf16.mxu0 %v3708_v53 }
 0x188   : > { %2272 = vmatprep.subr.bf16.mxu1 %v3711_v54 }
 0x18a   : > { %2232 = vmatpush1.bf16.msra.mxu0 %v3706_v55 }
 0x18b   : > { %2273 = vmatpush1.bf16.msra.mxu1 %v3709_v56  ;;  %2233 = vmatprep.subr.bf16.mxu0 %v3714_v57 }
 0x18c   : > { %2274 = vmatprep.subr.bf16.mxu1 %v3717_v58 }
 0x18e   : > { %2234 = vmatpush1.bf16.msra.mxu0 %v3712_v59 }
 0x18f   : > { %2275 = vmatpush1.bf16.msra.mxu1 %v3715_v60  ;;  %2235 = vmatprep.subr.bf16.mxu0 %v3720_v61 }
 0x190   : > { %2276 = vmatprep.subr.bf16.mxu1 %v3723_v62  ;;  %v399_v62 = vld [vmem:[#allocation2 + $0x10] sm:$0xff] }
 0x192   : > { %2236 = vmatpush1.bf16.msra.mxu0 %v3718_v63 }
 0x193   : > { %2277 = vmatpush1.bf16.msra.mxu1 %v3721_v0  ;;  %2237 = vmatprep.subr.bf16.mxu0 %v3726_v1 }
 0x194   : > { %2278 = vmatprep.subr.bf16.mxu1 %v3729_v2 }
 0x196   : > { %2238 = vmatpush1.bf16.msra.mxu0 %v3724_v3  ;;  %v400_v3 = vld [vmem:[#allocation2 + $0x18] sm:$0xff] }
 0x197   : > { %2279 = vmatpush1.bf16.msra.mxu1 %v3727_v4  ;;  %2239 = vmatprep.subr.bf16.mxu0 %v3732_v5 }
 0x198   : > { %2280 = vmatprep.subr.bf16.mxu1 %v3735_v6 }
 0x19a   : > { %2240 = vmatpush1.bf16.msra.mxu0 %v3730_v9 }
 0x19b   : > { %2281 = vmatpush1.bf16.msra.mxu1 %v3733_v10  ;;  %2241 = vmatprep.subr.bf16.mxu0 %v3738_v11  ;;  %v2415_v11 = vld [vmem:[%s4830_s3 + $0x80] sm:$0xff] (!%p3097_p12) }
 0x19c   : > { %2282 = vmatprep.subr.bf16.mxu1 %v3741_v12  ;;  %v2416_v12 = vld [vmem:[%s4830_s3 + $0x88] sm:$0xff] (!%p3097_p12) }
 0x19e   : > { %2242 = vmatpush1.bf16.msra.mxu0 %v3736_v13  ;;  %v2399_v13 = vld [vmem:[%s4830_s3] sm:$0xff] (!%p3097_p12) }
 0x19f   : > { %2283 = vmatpush1.bf16.msra.mxu1 %v3739_v14  ;;  %2243 = vmatprep.subr.bf16.mxu0 %v3744_v15  ;;  %v3204_v14 = vpack.c.bf16 (!%p3097_p12), %v2416_v12, %v2415_v11  ;;  %v2400_v15 = vld [vmem:[%s4830_s3 + $0x8] sm:$0xff] (!%p3097_p12)  ;;  %v2458_v11 = vld [vmem:[%s4830_s3 + $0x1d8] sm:$0xff] (!%p3097_p12) }
 0x1a0   : > { %2284 = vmatprep.subr.bf16.mxu1 %v3747_v16  ;;  %v2447_v16 = vld [vmem:[%s4830_s3 + $0x180] sm:$0xff] (!%p3097_p12) }
 0x1a2   : > { %2244 = vmatpush1.bf16.msra.mxu0 %v3742_v19  ;;  %v2448_v19 = vld [vmem:[%s4830_s3 + $0x188] sm:$0xff] (!%p3097_p12) }
 0x1a3   : > { %2285 = vmatpush1.bf16.msra.mxu1 %v3745_v20  ;;  %2245 = vmatprep.subr.bf16.mxu0 %v3750_v21  ;;  %v3975_v20 = vmov (!%p3097_p12), 0   ;;  %v3206_v21 = vpack.c.bf16 (!%p3097_p12), %v2400_v15, %v2399_v13  ;;  %v2409_v13 = vld [vmem:[%s4830_s3 + $0x50] sm:$0xff] (!%p3097_p12) }
 0x1a4   : > { %2286 = vmatprep.subr.bf16.mxu1 %v3753_v22  ;;  %3754 = vset.pattern.permute.xlu0 (!%p3097_p12), %v3975_v20  ;;  %v3236_v22 = vpack.c.bf16 (!%p3097_p12), %v2448_v19, %v2447_v16  ;;  %v2410_v16 = vld [vmem:[%s4830_s3 + $0x58] sm:$0xff] (!%p3097_p12)  ;;  %v2441_v19 = vld [vmem:[%s4830_s3 + $0x150] sm:$0xff] (!%p3097_p12) }
 0x1a5   : > { %v2442_v20 = vld [vmem:[%s4830_s3 + $0x158] sm:$0xff] (!%p3097_p12) }
 0x1a6   : > { %2246 = vmatpush1.bf16.msra.mxu0 %v3748_v23  ;;  %v2431_v23 = vld [vmem:[%s4830_s3 + $0x100] sm:$0xff] (!%p3097_p12) }
 0x1a7   : > { %2287 = vmatpush1.bf16.msra.mxu1 %v3751_v24  ;;  %v2432_v24 = vld [vmem:[%s4830_s3 + $0x108] sm:$0xff] (!%p3097_p12)  ;;  %3205 = vmatprep.subr.bf16.mxu0 (!%p3097_p12), %v3204_v14 }
 0x1a8   : > { %3237 = vmatprep.subr.bf16.mxu1 (!%p3097_p12), %v3236_v22  ;;  %v2427_v22 = vld [vmem:[%s4830_s3 + $0xe0] sm:$0xff] (!%p3097_p12) }
 0x1a9   : > { %2248 = vmatmul.mubr.bf16.vlgmr.msra.gmra.mrb[12].mxu0 %v4427_v17 }
 0x1aa   : > { %2289 = vmatmul.mubr.bf16.vlgmr.msra.gmra.mrb[12].mxu1 %v4431_v18  ;;  %3207 = vmatpush3.bf16.msra.mxu0 (!%p3097_p12), %v3206_v21 }
 0x1bc   : > { %v2003_v25 = vpop.f32.mrb[0].mxu0 }
 0x1bd   : > { %v2044_v26 = vpop.f32.mrb[0].mxu1  ;;  %v2005_v28 = vpop.f32.mrb[1].mxu0 }
 0x1be   : > { %v2045_v27 = vadd.f32 %v2044_v26, %v2003_v25  ;;  %v2046_v29 = vpop.f32.mrb[1].mxu1  ;;  %v2007_v31 = vpop.f32.mrb[2].mxu0  ;;  %v2417_v25 = vld [vmem:[%s4830_s3 + $0x90] sm:$0xff] (!%p3097_p12)  ;;  %v3238_v26 = vpack.c.bf16 (!%p3097_p12), %v2432_v24, %v2431_v23  ;;  %v2428_v23 = vld [vmem:[%s4830_s3 + $0xe8] sm:$0xff] (!%p3097_p12)  ;;  %v2411_v24 = vld [vmem:[%s4830_s3 + $0x60] sm:$0xff] (!%p3097_p12) }
 0x1bf   : > { %v2047_v30 = vadd.f32 %v2046_v29, %v2005_v28  ;;  %v2048_v32 = vpop.f32.mrb[2].mxu1  ;;  %v2008_v7 = vpop.f32.mrb[3].mxu0  ;;  %v2401_v28 = vld [vmem:[%s4830_s3 + $0x10] sm:$0xff] (!%p3097_p12)  ;;  %v2402_v29 = vld [vmem:[%s4830_s3 + $0x18] sm:$0xff] (!%p3097_p12) }
 0x1c0   : > { %v2049_v8 = vpop.f32.mrb[3].mxu1  ;;  %v3210_v31 = vpack.c.bf16 (!%p3097_p12), %v2402_v29, %v2401_v28  ;;  %v2449_v32 = vld [vmem:[%s4830_s3 + $0x190] sm:$0xff] (!%p3097_p12)  ;;  %v2450_v7 = vld [vmem:[%s4830_s3 + $0x198] sm:$0xff] (!%p3097_p12)  ;;  %3239 = vmatpush3.bf16.msra.mxu1 (!%p3097_p12), %v3238_v26  ;;  %v2412_v28 = vld [vmem:[%s4830_s3 + $0x68] sm:$0xff] (!%p3097_p12) }
 0x1c1   : > { %v2433_v8 = vld [vmem:[%s4830_s3 + $0x110] sm:$0xff] (!%p3097_p12)  ;;  %v2459_v29 = vld [vmem:[%s4830_s3 + $0x1e0] sm:$0xff] (!%p3097_p12) }
 0x1fc   : > { %v2085_v48 = vpop.f32.mrb[4].mxu0 }
 0x1fd   : > { %v2126_v52 = vpop.f32.mrb[4].mxu1  ;;  %v2086_v33 = vadd.f32 %v2085_v48, %v2045_v27  ;;  %v2087_v37 = vpop.f32.mrb[5].mxu0  ;;  %v2418_v27 = vld [vmem:[%s4830_s3 + $0x98] sm:$0xff] (!%p3097_p12)  ;;  %v3240_v48 = vpack.c.bf16 (!%p3097_p12), %v2450_v7, %v2449_v32  ;;  %v3226_v32 = vpack.c.bf16 (!%p3097_p12), %v2410_v16, %v2409_v13  ;;  %v2443_v7 = vld [vmem:[%s4830_s3 + $0x160] sm:$0xff] (!%p3097_p12) }
 0x1fe   : > { %v2128_v38 = vpop.f32.mrb[5].mxu1  ;;  %v2088_v35 = vadd.f32 %v2087_v37, %v2047_v30  ;;  %v2089_v17 = vpop.f32.mrb[6].mxu0  ;;  %v3208_v30 = vpack.c.bf16 (!%p3097_p12), %v2418_v27, %v2417_v25  ;;  %v2420_v37 = vld [vmem:[%s4830_s3 + $0xa8] sm:$0xff] (!%p3097_p12) }
 0x1ff   : > { %v2130_v36 = vpop.f32.mrb[6].mxu1  ;;  %v2127_v18 = vadd.f32 %v2126_v52, %v2086_v33  ;;  %v2090_v40 = vpop.f32.mrb[7].mxu0  ;;  %v2434_v52 = vld [vmem:[%s4830_s3 + $0x118] sm:$0xff] (!%p3097_p12)  ;;  %v2419_v33 = vld [vmem:[%s4830_s3 + $0xa0] sm:$0xff] (!%p3097_p12)  ;;  %v2404_v17 = vld [vmem:[%s4830_s3 + $0x28] sm:$0xff] (!%p3097_p12)  ;;  %3241 = vmatprep.subr.bf16.mxu1 (!%p3097_p12), %v3240_v48 }
 0x200   : > { %v2131_v41 = vpop.f32.mrb[7].mxu1  ;;  %v2129_v42 = vadd.f32 %v2128_v38, %v2088_v35  ;;  %3209 = vmatprep.subr.bf16.mxu0 (!%p3097_p12), %v3208_v30  ;;  %v3242_v38 = vpack.c.bf16 (!%p3097_p12), %v2434_v52, %v2433_v8  ;;  %v2403_v35 = vld [vmem:[%s4830_s3 + $0x20] sm:$0xff] (!%p3097_p12)  ;;  %v2436_v40 = vld [vmem:[%s4830_s3 + $0x128] sm:$0xff] (!%p3097_p12)  ;;  %v2429_v48 = vld [vmem:[%s4830_s3 + $0xf0] sm:$0xff] (!%p3097_p12)  ;;  %v3258_v52 = vpack.c.bf16 (!%p3097_p12), %v2442_v20, %v2441_v19 }
 0x201   : > { %v2297_v43 = vadd.f32 %v2127_v18, %v397_v34  ;;  %v3212_v34 = vpack.c.bf16 (!%p3097_p12), %v2420_v37, %v2419_v33  ;;  %v2451_v36 = vld [vmem:[%s4830_s3 + $0x1a0] sm:$0xff] (!%p3097_p12)  ;;  %v2452_v18 = vld [vmem:[%s4830_s3 + $0x1a8] sm:$0xff] (!%p3097_p12)  ;;  %3211 = vmatpush3.bf16.msra.mxu0 (!%p3097_p12), %v3210_v31  ;;  %v3214_v41 = vpack.c.bf16 (!%p3097_p12), %v2404_v17, %v2403_v35  ;;  %v3228_v33 = vpack.c.bf16 (!%p3097_p12), %v2428_v23, %v2427_v22  ;;  %v2430_v37 = vld [vmem:[%s4830_s3 + $0xf8] sm:$0xff] (!%p3097_p12) }
 0x202   : > { %v2298_v44 = vadd.f32 %v2129_v42, %v398_v39  ;;  %v2435_v39 = vld [vmem:[%s4830_s3 + $0x120] sm:$0xff] (!%p3097_p12)  ;;  %v3244_v42 = vpack.c.bf16 (!%p3097_p12), %v2452_v18, %v2451_v36  ;;  %3243 = vmatpush3.bf16.msra.mxu1 (!%p3097_p12), %v3242_v38  ;;  %v2460_v30 = vld [vmem:[%s4830_s3 + $0x1e8] sm:$0xff] (!%p3097_p12) }
 0x203   : > { %2301 = vst [vmem:[#allocation2] sm:$0xff] %v2297_v43  ;;  %v2421_v43 = vld [vmem:[%s4830_s3 + $0xb0] sm:$0xff] (!%p3097_p12)  ;;  %3213 = vmatprep.subr.bf16.mxu0 (!%p3097_p12), %v3212_v34  ;;  %v2444_v8 = vld [vmem:[%s4830_s3 + $0x168] sm:$0xff] (!%p3097_p12)  ;;  %v2313_v34 = vld [vmem:[#allocation7] sm:$0xf] (!%p3097_p12)  ;;  %v3260_v35 = vpack.c.bf16 (!%p3097_p12), %v2460_v30, %v2459_v29 }
 0x204   : > { %2302 = vst [vmem:[#allocation2 + $0x8] sm:$0xff] %v2298_v44  ;;  %v2422_v44 = vld [vmem:[%s4830_s3 + $0xb8] sm:$0xff] (!%p3097_p12)  ;;  %3245 = vmatprep.subr.bf16.mxu1 (!%p3097_p12), %v3244_v42  ;;  %v3230_v42 = vpack.c.bf16 (!%p3097_p12), %v2412_v28, %v2411_v24 }
 0x205   : > { %3215 = vmatpush3.bf16.msra.mxu0 (!%p3097_p12), %v3214_v41 }
 0x20a   : > { %v2309_v36 = vld [vmem:[#allocation2] sm:$0xff] (!%p3097_p12) }
 0x20b   : > { %v2310_v38 = vld [vmem:[#allocation2 + $0x8] sm:$0xff] (!%p3097_p12) }
 0x23c   : > { %v2167_v45 = vpop.f32.mrb[8].mxu0 }
 0x23d   : > { %v2208_v46 = vpop.f32.mrb[8].mxu1  ;;  %v2169_v49 = vpop.f32.mrb[9].mxu0 }
 0x23e   : > { %v2209_v47 = vadd.f32 %v2208_v46, %v2167_v45  ;;  %v2210_v50 = vpop.f32.mrb[9].mxu1  ;;  %v2171_v53 = vpop.f32.mrb[10].mxu0  ;;  %v2405_v45 = vld [vmem:[%s4830_s3 + $0x30] sm:$0xff] (!%p3097_p12)  ;;  %v3246_v46 = vpack.c.bf16 (!%p3097_p12), %v2436_v40, %v2435_v39 }
 0x23f   : > { %v2211_v51 = vadd.f32 %v2210_v50, %v2169_v49  ;;  %v2212_v54 = vpop.f32.mrb[10].mxu1  ;;  %v2172_v55 = vpop.f32.mrb[11].mxu0  ;;  %v2406_v49 = vld [vmem:[%s4830_s3 + $0x38] sm:$0xff] (!%p3097_p12)  ;;  %v2453_v50 = vld [vmem:[%s4830_s3 + $0x1b0] sm:$0xff] (!%p3097_p12) }
 0x240   : > { %v2213_v56 = vpop.f32.mrb[11].mxu1  ;;  %v2437_v54 = vld [vmem:[%s4830_s3 + $0x130] sm:$0xff] (!%p3097_p12)  ;;  %v2438_v55 = vld [vmem:[%s4830_s3 + $0x138] sm:$0xff] (!%p3097_p12)  ;;  %3247 = vmatpush3.bf16.msra.mxu1 (!%p3097_p12), %v3246_v46  ;;  %v2625_v46 = vld [vmem:[%s4832_s5] sm:$0xff] (!%p3097_p12) }
 0x241   : > { %v2423_v56 = vld [vmem:[%s4830_s3 + $0xc0] sm:$0xff] (!%p3097_p12)  ;;  %2628 = vperm.xlu0 (!%p3097_p12), %3754, %v2625_v46  }
 0x27c   : > { %v2249_v57 = vpop.f32.mrb[12].mxu0 }
 0x27d   : > { %v2290_v58 = vpop.f32.mrb[12].mxu1  ;;  %v2250_v59 = vadd.f32 %v2249_v57, %v2209_v47  ;;  %v2251_v60 = vpop.f32.mrb[13].mxu0  ;;  %v3216_v47 = vpack.c.bf16 (!%p3097_p12), %v2422_v44, %v2421_v43  ;;  %v2315_v57 = vlaneseq (!%p3097_p12)  ;;  %v2461_v43 = vld [vmem:[%s4830_s3 + $0x1f0] sm:$0xff] (!%p3097_p12)  ;;  %v2462_v44 = vld [vmem:[%s4830_s3 + $0x1f8] sm:$0xff] (!%p3097_p12) }
 0x27e   : > { %v2292_v61 = vpop.f32.mrb[13].mxu1  ;;  %v2252_v63 = vadd.f32 %v2251_v60, %v2211_v51  ;;  %v2253_v0 = vpop.f32.mrb[14].mxu0  ;;  %2308 = sbr.rel (%p3097_p12) target bundleno = 1159 (0x487), region = 80  ;;  %v2454_v51 = vld [vmem:[%s4830_s3 + $0x1b8] sm:$0xff] (!%p3097_p12)  ;;  %v2455_v60 = vld [vmem:[%s4830_s3 + $0x1c0] sm:$0xff] (!%p3097_p12) }
 0x27f   : > { %v2294_v1 = vpop.f32.mrb[14].mxu1  ;;  %v2291_v2 = vadd.f32 %v2290_v58, %v2250_v59  ;;  %v2254_v4 = vpop.f32.mrb[15].mxu0  ;;  %v3248_v53 = vpack.c.bf16 (!%p3097_p12), %v2454_v51, %v2453_v50  ;;  %v2424_v58 = vld [vmem:[%s4830_s3 + $0xc8] sm:$0xff] (!%p3097_p12)  ;;  %v3218_v59 = vpack.c.bf16 (!%p3097_p12), %v2406_v49, %v2405_v45  ;;  %3217 = vmatprep.subr.bf16.mxu0 (!%p3097_p12), %v3216_v47  ;;  %v2407_v0 = vld [vmem:[%s4830_s3 + $0x40] sm:$0xff] (!%p3097_p12)  ;;  %v3262_v51 = vpack.c.bf16 (!%p3097_p12), %v2444_v8, %v2443_v7 }
 0x280   : > { %v2295_v5 = vpop.f32.mrb[15].mxu1  ;;  %v2293_v6 = vadd.f32 %v2292_v61, %v2252_v63  ;;  %v2456_v61 = vld [vmem:[%s4830_s3 + $0x1c8] sm:$0xff] (!%p3097_p12)  ;;  %v3220_v63 = vpack.c.bf16 (!%p3097_p12), %v2424_v58, %v2423_v56  ;;  %v2445_v58 = vld [vmem:[%s4830_s3 + $0x170] sm:$0xff] (!%p3097_p12) }
 0x281   : > { %v2299_v9 = vadd.f32 %v2291_v2, %v399_v62  ;;  %v3250_v62 = vpack.c.bf16 (!%p3097_p12), %v2438_v55, %v2437_v54  ;;  %v2408_v1 = vld [vmem:[%s4830_s3 + $0x48] sm:$0xff] (!%p3097_p12)  ;;  %v2439_v2 = vld [vmem:[%s4830_s3 + $0x140] sm:$0xff] (!%p3097_p12)  ;;  %3249 = vmatprep.subr.bf16.mxu1 (!%p3097_p12), %v3248_v53  ;;  %v2425_v5 = vld [vmem:[%s4830_s3 + $0xd0] sm:$0xff] (!%p3097_p12)  ;;  %3219 = vmatpush3.bf16.msra.mxu0 (!%p3097_p12), %v3218_v59  ;;  %v3232_v53 = vpack.c.bf16 (!%p3097_p12), %v2430_v37, %v2429_v48 }
 0x282   : > { %v2300_v10 = vadd.f32 %v2293_v6, %v400_v3  ;;  %v3252_v3 = vpack.c.bf16 (!%p3097_p12), %v2456_v61, %v2455_v60  ;;  %v2440_v4 = vld [vmem:[%s4830_s3 + $0x148] sm:$0xff] (!%p3097_p12)  ;;  %v2426_v6 = vld [vmem:[%s4830_s3 + $0xd8] sm:$0xff] (!%p3097_p12)  ;;  %v3222_v12 = vpack.c.bf16 (!%p3097_p12), %v2408_v1, %v2407_v0  ;;  %3221 = vmatprep.subr.bf16.mxu0 (!%p3097_p12), %v3220_v63  ;;  %v2413_v54 = vld [vmem:[%s4830_s3 + $0x70] sm:$0xff] (!%p3097_p12) }
 0x283   : > { %2303 = vst [vmem:[#allocation2 + $0x10] sm:$0xff] %v2299_v9  ;;  %v2316_v9 = vshrl.u32 (!%p3097_p12), %v2315_v57, 7  ;;  %3251 = vmatpush3.bf16.msra.mxu1 (!%p3097_p12), %v3250_v62  ;;  %v3254_v14 = vpack.c.bf16 (!%p3097_p12), %v2440_v4, %v2439_v2  ;;  %v3224_v15 = vpack.c.bf16 (!%p3097_p12), %v2426_v6, %v2425_v5  ;;  %v2414_v55 = vld [vmem:[%s4830_s3 + $0x78] sm:$0xff] (!%p3097_p12)  ;;  %v3264_v57 = vpack.c.bf16 (!%p3097_p12), %v2462_v44, %v2461_v43 }
 0x284   : > { %2304 = vst [vmem:[#allocation2 + $0x18] sm:$0xff] %v2300_v10  ;;  %v2457_v10 = vld [vmem:[%s4830_s3 + $0x1d0] sm:$0xff] (!%p3097_p12)  ;;  %3253 = vmatprep.subr.bf16.mxu1 (!%p3097_p12), %v3252_v3  ;;  %v2446_v59 = vld [vmem:[%s4830_s3 + $0x178] sm:$0xff] (!%p3097_p12)  ;;  %v3234_v0 = vpack.c.bf16 (!%p3097_p12), %v2414_v55, %v2413_v54  ;;  %v2632_v55 = vld [vmem:[%s4833_s6] sm:$0xff] (!%p3097_p12) }
 0x285   : > { %v3256_v21 = vpack.c.bf16 %v2458_v11, %v2457_v10  ;;  %v2321_v25 = vsub.s32 1, %v2316_v9  ;;  %v2317_v26 = vsub.s32 0, %v2316_v9  ;;  %v2329_v27 = vsub.s32 3, %v2316_v9  ;;  %3223 = vmatpush3.bf16.msra.mxu0 %v3222_v12 }
 0x286   : > { %v2325_v31 = vsub.s32 2, %v2316_v9  ;;  %3225 = vmatprep.subr.bf16.mxu0 %v3224_v15  ;;  %v3266_v3 = vpack.c.bf16 %v2446_v59, %v2445_v58  ;;  %v3976_v58 = vmov 0.0|0.0  }
 0x287   : > { %3255 = vmatpush3.bf16.msra.mxu1 %v3254_v14  ;;  %v2322_v17 = vrot.slane %v2313_v34, %v2321_v25  ;;  %v2318_v18 = vrot.slane %v2313_v34, %v2317_v26  ;;  %v2330_v40 = vrot.slane %v2313_v34, %v2329_v27 }
 0x288   : > { %3257 = vmatprep.subr.bf16.mxu1 %v3256_v21  ;;  %v2326_v45 = vrot.slane %v2313_v34, %v2325_v31 }
 0x289   : > { %3227 = vmatpush3.bf16.msra.mxu0 %v3226_v32  ;;  %v4753_v47 = vadd.f32 %v2322_v17, %v2310_v38  ;;  %v4755_v49 = vadd.f32 %v2318_v18, %v2309_v36 }
 0x28a   : > { %v2311_v41 = vld [vmem:[#allocation2 + $0x10] sm:$0xff]  ;;  %3229 = vmatprep.subr.bf16.mxu0 %v3228_v33 }
 0x28b   : > { %v2312_v39 = vld [vmem:[#allocation2 + $0x18] sm:$0xff]  ;;  %3259 = vmatpush3.bf16.msra.mxu1 %v3258_v52  ;;  %v4765_v56 = vadd.f32 %v2326_v45, %v2311_v41  ;;  %v2344_v60 = vand.u32 2147483647, %v4753_v47  ;;  %v2343_v61 = vand.u32 2147483647, %v4755_v49  ;;  %v2340_v48 = vmax.f32 %v4753_v47, 0.0 }
 0x28c   : > { %v4757_v50 = vadd.f32 %v2330_v40, %v2312_v39  ;;  %3261 = vmatprep.subr.bf16.mxu1 %v3260_v35  ;;  %v2339_v35 = vmax.f32 %v4755_v49, 0.0 }
 0x28d   : > { %v2345_v63 = vand.u32 2147483647, %v4765_v56  ;;  %3231 = vmatpush3.bf16.msra.mxu0 %v3230_v42  ;;  %v2348_v1 = vsub.f32 0.0, %v2344_v60  ;;  %v2347_v2 = vsub.f32 0.0, %v2343_v61  ;;  %v2341_v46 = vmax.f32 %v4765_v56, 0.0  ;;  %v2634_v56 = vld [vmem:[%s4833_s6 + $0x10] sm:$0xff] }
 0x28e   : > { %v2346_v62 = vand.u32 2147483647, %v4757_v50  ;;  %3233 = vmatprep.subr.bf16.mxu0 %v3232_v53  ;;  %v2342_v39 = vmax.f32 %v4757_v50, 0.0  ;;  %v2635_v60 = vld [vmem:[%s4833_s6 + $0x18] sm:$0xff] }
 0x28f   : > { %3263 = vmatpush3.bf16.msra.mxu1 %v3262_v51  ;;  %v2349_v5 = vsub.f32 0.0, %v2345_v63  ;;  %v2353_v6 = vmul.f32 1.442695, %v2348_v1  ;;  %v2351_v9 = vmul.f32 1.442695, %v2347_v2  ;;  %v3272_v61 = vpack.c.bf16 %v2635_v60, %v2634_v56  ;;  %v2637_v63 = vld [vmem:[%s4833_s6 + $0x28] sm:$0xff] }
 0x290   : > { %v2350_v4 = vsub.f32 0.0, %v2346_v62  ;;  %3265 = vmatprep.subr.bf16.mxu1 %v3264_v57  ;;  %v2633_v57 = vld [vmem:[%s4833_s6 + $0x8] sm:$0xff]  ;;  %v2636_v62 = vld [vmem:[%s4833_s6 + $0x20] sm:$0xff]  ;;  %v2638_v1 = vld [vmem:[%s4833_s6 + $0x30] sm:$0xff] }
 0x291   : > { %v2355_v11 = vmul.f32 1.442695, %v2349_v5  ;;  %3235 = vmatpush3.bf16.msra.mxu0 %v3234_v0  ;;  %3755 = vpow2.f32 %v2353_v6  ;;  %v3269_v59 = vpack.c.bf16 %v2633_v57, %v2632_v55  ;;  %v3275_v0 = vpack.c.bf16 %v2637_v63, %v2636_v62  ;;  %v2639_v2 = vld [vmem:[%s4833_s6 + $0x38] sm:$0xff]  ;;  %v3098_v6 = vld [vmem:[#allocation8] ss:$0 sm:$0xff] }
 0x292   : > { %v2357_v10 = vmul.f32 1.442695, %v2350_v4  ;;  %3757 = vpow2.f32 %v2351_v9  ;;  %3268 = vmatprep.subr.bf16.mxu0 %v3976_v58  ;;  %v3978_v4 = vmov 0.0  }
 0x293   : > { %3267 = vmatpush3.bf16.msra.mxu1 %v3266_v3  ;;  %v3278_v3 = vpack.c.bf16 %v2639_v2, %v2638_v1 }
 0x294   : > { %3759 = vpow2.f32 %v2357_v10 }
 0x295   : > { %3761 = vpow2.f32 %v2355_v11 }
 0x29b   : > { %v3756_v12 = vpop.eup %3755 }
 0x29c   : > { %v3758_v13 = vpop.eup %3757  ;;  %v2368_v14 = vadd.f32 1.0, %v3756_v12  ;;  %v2371_v21 = vmul.f32 -0.5, %v3756_v12  ;;  %v2374_v27 = vand.u32 2147483647, %v3756_v12 }
 0x29d   : > { %v2359_v16 = vadd.f32 1.0, %v3758_v13  ;;  %v2362_v22 = vmul.f32 -0.5, %v3758_v13  ;;  %v2365_v29 = vand.u32 2147483647, %v3758_v13 }
 0x29e   : > { %v3760_v15 = vpop.eup %3759  ;;  %3763 = vlog2.f32 %v2368_v14  ;;  %v2372_v25 = vadd.f32 1.0, %v2371_v21  ;;  %vm4778_vm0 = vcmp.lt.f32.partialorder %v2374_v27, 0.0004427343 }
 0x29f   : > { %v3762_v19 = vpop.eup %3761  ;;  %v2386_v20 = vadd.f32 1.0, %v3760_v15  ;;  %3765 = vlog2.f32 %v2359_v16  ;;  %v2389_v24 = vmul.f32 -0.5, %v3760_v15  ;;  %v2363_v28 = vadd.f32 1.0, %v2362_v22 }
 0x2a0   : > { %v2377_v23 = vadd.f32 1.0, %v3762_v19  ;;  %v2380_v26 = vmul.f32 -0.5, %v3762_v19  ;;  %v2392_v31 = vand.u32 2147483647, %v3760_v15  ;;  %v2373_v32 = vmul.f32 %v3756_v12, %v2372_v25 }
 0x2a1   : > { %3767 = vlog2.f32 %v2386_v20  ;;  %v2390_v30 = vadd.f32 1.0, %v2389_v24  ;;  %v2364_v33 = vmul.f32 %v3758_v13, %v2363_v28  ;;  %v2383_v37 = vand.u32 2147483647, %v3762_v19 }
 0x2a2   : > { %3769 = vlog2.f32 %v2377_v23  ;;  %v2381_v7 = vadd.f32 1.0, %v2380_v26  ;;  %vm2366_vm1 = vcmp.lt.f32.partialorder %v2365_v29, 0.0004427343  ;;  %vm2393_vm2 = vcmp.lt.f32.partialorder %v2392_v31, 0.0004427343 }
 0x2a3   : > { %v2391_v17 = vmul.f32 %v3760_v15, %v2390_v30  ;;  %vm2384_vm3 = vcmp.lt.f32.partialorder %v2383_v37, 0.0004427343 }
 0x2a4   : > { %v2382_v42 = vmul.f32 %v3762_v19, %v2381_v7 }
 0x2a8   : > { %v3764_v8 = vpop.eup %3763 }
 0x2a9   : > { %v3766_v38 = vpop.eup %3765  ;;  %v2370_v34 = vmul.f32 0.6931472, %v3764_v8  ;;  %v3099_v8 = vld [vmem:[#allocation10] ss:$0 sm:$0xff] }
 0x2aa   : > { %v2361_v18 = vmul.f32 0.6931472, %v3766_v38 }
 0x2ab   : > { %v3768_v36 = vpop.eup %3767  ;;  %v2376_v40 = vsel %vm4778_vm0, %v2373_v32, %v2370_v34 }
 0x2ac   : > { %v2388_v41 = vmul.f32 0.6931472, %v3768_v36  ;;  %v3770_v43 = vpop.eup %3769  ;;  %v2396_v44 = vadd.f32 %v2376_v40, %v2340_v48  ;;  %v2367_v45 = vsel %vm2366_vm1, %v2364_v33, %v2361_v18 }
 0x2ad   : > { %v2395_v47 = vadd.f32 %v2367_v45, %v2339_v35  ;;  %v2379_v51 = vmul.f32 0.6931472, %v3770_v43 }
 0x2ae   : > { %v2394_v49 = vsel %vm2393_vm2, %v2391_v17, %v2388_v41  ;;  %2534 = vmatprep.mubr.f32.mxu0 %v2396_v44 }
 0x2af   : > { %v2398_v53 = vadd.f32 %v2394_v49, %v2342_v39  ;;  %2535 = vmatmul.mubr.f32.vlgmr.msra.gmra.mrb[0].mxu0 %v2395_v47  ;;  %v2385_v54 = vsel %vm2384_vm3, %v2382_v42, %v2379_v51 }
 0x2b0   : > { %v2397_v50 = vadd.f32 %v2385_v54, %v2341_v46  ;;  %3270 = vmatpush3.bf16.msra.mxu0 %v3269_v59  ;;  %3201 = vmatprep.mubr.msk.f32.mxu0 %vm3977_vm4, %v3978_v4 }
 0x2b1   : > { %2604 = vmatprep.mubr.f32.mxu1 %v2398_v53  ;;  %3271 = vmatprep.subr.bf16.mxu0 %v3976_v58 }
 0x2b2   : > { %2605 = vmatmul.mubr.f32.vlgmr.msra.gmra.mrb[0].mxu1 %v2397_v50 }
 0x2b4   : > { %3273 = vmatpush3.bf16.msra.mxu0 %v3272_v61 }
 0x2b5   : > { %3274 = vmatprep.subr.bf16.mxu0 %v3976_v58 }
 0x2b8   : > { %3276 = vmatpush3.bf16.msra.mxu0 %v3275_v0 }
 0x2b9   : > { %3277 = vmatprep.subr.bf16.mxu0 %v3976_v58 }
 0x2bc   : > { %3279 = vmatpush3.bf16.msra.mxu0 %v3278_v3 }
 0x2c0   : > { %v2629_v30 = vpop.permute.xlu0 %2628 }
 0x382   : > { %v3138_v5 = vpop.f32.mrb[0].mxu0 }
 0x383   : > { %v3139_v9 = vpop.f32.mrb[1].mxu0 }
 0x384   : > { %v3140_v10 = vadd.f32 %v3139_v9, %v3138_v5 }
 0x385   : > { %v3173_v11 = vpop.f32.mrb[0].mxu1 }
 0x386   : > { %v2537_v12 = vadd.f32 %v3140_v10, %v3098_v6  ;;  %v3174_v13 = vpop.f32.mrb[1].mxu1 }
 0x387   : > { %v3175_v14 = vadd.f32 %v3174_v13, %v3173_v11 }
 0x389   : > { %v2607_v15 = vadd.f32 %v3175_v14, %v2537_v12 }
 0x38b   : > { %v2611_v16 = vand.u32 2147483647, %v2607_v15  ;;  %v2610_v29 = vmax.f32 %v2607_v15, 0.0 }
 0x38d   : > { %v2612_v19 = vsub.f32 0.0, %v2611_v16 }
 0x38f   : > { %v2613_v20 = vmul.f32 1.442695, %v2612_v19 }
 0x391   : > { %3771 = vpow2.f32 %v2613_v20 }
 0x39b   : > { %v3772_v21 = vpop.eup %3771 }
 0x39c   : > { %v2615_v22 = vadd.f32 1.0, %v3772_v21  ;;  %v2618_v23 = vmul.f32 -0.5, %v3772_v21  ;;  %v2621_v25 = vand.u32 2147483647, %v3772_v21 }
 0x39e   : > { %3773 = vlog2.f32 %v2615_v22  ;;  %v2619_v24 = vadd.f32 1.0, %v2618_v23  ;;  %vm2622_vm5 = vcmp.lt.f32.partialorder %v2621_v25, 0.0004427343 }
 0x3a0   : > { %v2620_v28 = vmul.f32 %v3772_v21, %v2619_v24 }
 0x3a8   : > { %v3774_v26 = vpop.eup %3773 }
 0x3a9   : > { %v2617_v27 = vmul.f32 0.6931472, %v3774_v26 }
 0x3ab   : > { %v2623_v31 = vsel %vm2622_vm5, %v2620_v28, %v2617_v27 }
 0x3ac   : > { %v2624_v32 = vadd.f32 %v2623_v31, %v2610_v29 }
 0x3ae   : > { %v2631_v7 = vadd.f32 %v2629_v30, %v2624_v32 }
 0x3b0   : > { %3202 = vmatmul.mubr.msk.f32.vlgmr.msra.gmra.mrb[2].mxu0 %vm2647_vm6, %v2631_v7 }
 0x483   : > { %v2717_v48 = vpop.f32.mrb[2].mxu0 }
 0x484   : > { %v2718_v52 = vadd.f32 %v3099_v8, %v2717_v48  ;;  %v3203_v33 = vpop.f32.mrb[3].mxu0 }
 0x486   : > { %2722 = vst.msk [vmem:[%s4835_s8] sm:$0xff] %vm2721_vm7, %v2718_v52 }
 0x487 PF: > { %p22_p0 = scmp.ge.s32.totalorder %s4145_s24, 6   ;;  %s4855_s27 = smov %s3957_s28 }
 0x488   : > { %s4856_s28 = smov %s3961_s29  ;;  %s4857_s29 = smov %s4155_s12 }
 0x489   : > { %s4858_s30 = smov %s4145_s24  ;;  %24 = sbr.rel (!%p22_p0) target bundleno = 8 (0x8), region = 121 }
 0x490   :  { %2734 = vsyncpa [#allocation4], 1 }
 0x491   :  { %2736 = vsyncpa [#allocation4 + $0x1], 1 }
 0x492   :  { %2737 = vsyncpa [#allocation6], 1 }
 0x493   :  { %2739 = vsyncpa [#allocation6 + $0x1], 1 }
 0x494   :  { %2740 = vsyncpa [#allocation9], 1 }

</bundles_post_ra>
